<compile_context>
chip_gen: v6e
topology: v6e:2x2x1
jax: 0.10.0
libtpu: 0.0.40
codegen_flags: <defaults>
</compile_context>

<pallas_src>
import numpy as np
import jax
import jax.numpy as jnp
from jax.experimental import pallas as pl
from jax.experimental.pallas import tpu as pltpu

EPS = 1e-5  # nn.BatchNorm2d default eps


# ---------------------------------------------------------------------------
# Fused Pallas kernel: 5 x (lowered conv matmul + BN bias + ReLU) + Linear head
# ---------------------------------------------------------------------------
def _fused_cnn_kernel(x_ref,
                      w1_ref, b1_ref, w2_ref, b2_ref, w3_ref, b3_ref,
                      w4_ref, b4_ref, w5_ref, b5_ref,
                      wl_ref, bl_ref, o_ref):
    # x_ref: (N, H*W*Cin) bf16, NHWC-flattened input.
    x = x_ref[...]
    for w_ref, b_ref in ((w1_ref, b1_ref), (w2_ref, b2_ref), (w3_ref, b3_ref),
                         (w4_ref, b4_ref), (w5_ref, b5_ref)):
        acc = jnp.dot(x, w_ref[...], preferred_element_type=jnp.float32)
        x = jnp.maximum(acc + b_ref[...], 0.0).astype(jnp.bfloat16)
    # Layer-5 output is (N, 1*1*128): AdaptiveAvgPool2d(1) over a 1x1 map is the
    # identity, so feed it straight into the Linear head.
    o_ref[...] = (
        jnp.dot(x, wl_ref[...], preferred_element_type=jnp.float32) + bl_ref[...]
    )


# ---------------------------------------------------------------------------
# Offline weight preparation: fold im2col selection + BN(eval) into dense mats
# ---------------------------------------------------------------------------
def _selection_tensor(h, w, k=3, stride=2, pad=1):
    """0/1 tensor sel[t, p, q]: output pos p takes input pos q for tap t."""
    oh = (h + 2 * pad - k) // stride + 1
    ow = (w + 2 * pad - k) // stride + 1
    sel = np.zeros((k * k, oh * ow, h * w), np.float32)
    for oy in range(oh):
        for ox in range(ow):
            p = oy * ow + ox
            for dy in range(k):
                for dx in range(k):
                    iy = oy * stride - pad + dy
                    ix = ox * stride - pad + dx
                    if 0 <= iy < h and 0 <= ix < w:
                        sel[dy * k + dx, p, iy * w + ix] = 1.0
    return sel, oh, ow


def prepare_params(params, h, w):
    """Build per-layer lowered-conv matrices (NHWC-flat in/out) + bias rows."""
    layers = []
    hh, ww = h, w
    for (weight, scale, bias) in params["layers"]:
        oc, cin, k, _ = weight.shape
        sel, oh, ow = _selection_tensor(hh, ww, k=k, stride=2, pad=1)
        w_scaled = weight * scale[:, None, None, None]          # fold BN scale (f32)
        wt = jnp.transpose(w_scaled, (2, 3, 1, 0)).reshape(k * k, cin, oc)
        # BigW[q*Cin+c, p*OC+oc] = sum_t sel[t,p,q] * weight_scaled[oc,c,dy,dx]
        big = jnp.einsum("tpq,tco->qcpo", jnp.asarray(sel), wt)
        big = big.reshape(hh * ww * cin, oh * ow * oc).astype(jnp.bfloat16)
        brow = jnp.tile(bias, oh * ow).reshape(1, oh * ow * oc).astype(jnp.float32)
        layers.append((big, brow))
        hh, ww = oh, ow
    wl, bl = params["head"]
    head = (wl.T.astype(jnp.bfloat16), bl.reshape(1, -1).astype(jnp.float32))
    return {"layers": layers, "head": head}


# ---------------------------------------------------------------------------
# Forward pass (one pallas_call)
# ---------------------------------------------------------------------------
def simple_cnn_forward_fn(prepared, x_nchw):
    n, cin, h, w = x_nchw.shape
    # One cheap layout op: NCHW -> NHWC-flattened bf16. Everything else is in-kernel.
    x = x_nchw.transpose(0, 2, 3, 1).reshape(n, h * w * cin).astype(jnp.bfloat16)

    args = [x]
    for wmat, brow in prepared["layers"]:
        args += [wmat, brow]
    wl, bl = prepared["head"]
    args += [wl, bl]
    f = wl.shape[1]

    in_specs = [pl.BlockSpec(a.shape, lambda i: (0, 0)) for a in args]

    return pl.pallas_call(
        _fused_cnn_kernel,
        out_shape=jax.ShapeDtypeStruct((n, f), jnp.float32),
        grid=(1,),
        in_specs=in_specs,
        out_specs=pl.BlockSpec((n, f), lambda i: (0, 0)),
        compiler_params=pltpu.CompilerParams(
            dimension_semantics=("arbitrary",)),
    )(*args)


# ---------------------------------------------------------------------------
# Deterministic parameter init (shapes from SimpleCNN.__init__), BN folded (eval)
# ---------------------------------------------------------------------------
def init_params(key, in_channels, out_features):
    chans = [in_channels, 8, 16, 32, 64, 128]
    layers = []
    for i in range(5):
        cin, cout = chans[i], chans[i + 1]
        key, kw, kg, kb, km, kv = jax.random.split(key, 6)
        w = jax.random.normal(kw, (cout, cin, 3, 3), jnp.float32) / jnp.sqrt(cin * 9.0)
        gamma = 1.0 + 0.1 * jax.random.normal(kg, (cout,), jnp.float32)
        beta = 0.1 * jax.random.normal(kb, (cout,), jnp.float32)
        rmean = 0.05 * jax.random.normal(km, (cout,), jnp.float32)
        rvar = 1.0 + 0.1 * jnp.abs(jax.random.normal(kv, (cout,), jnp.float32))
        scale = gamma / jnp.sqrt(rvar + EPS)      # BN fold (eval mode)
        bias = beta - rmean * scale
        layers.append((w, scale, bias))
    key, kwl, kbl = jax.random.split(key, 3)
    wl = jax.random.normal(kwl, (out_features, 128), jnp.float32) / jnp.sqrt(128.0)
    bl = 0.1 * jax.random.normal(kbl, (out_features,), jnp.float32)
    return {"layers": layers, "head": (wl, bl)}


if __name__ == "__main__":
    key = jax.random.PRNGKey(0)
    kp, kx = jax.random.split(key)
    params = init_params(kp, in_channels=4, out_features=10)
    # Weight preprocessing happens once, outside the jitted forward.
    prepared = prepare_params(params, h=16, w=16)

    x = jax.random.normal(kx, (2, 4, 16, 16), jnp.float32)  # NCHW, like PyTorch
    fwd = jax.jit(simple_cnn_forward_fn)
    out = fwd(prepared, x)
    out = jax.block_until_ready(out)

    assert out.shape == (2, 10), out.shape
    assert bool(jnp.all(jnp.isfinite(out)))
    print("KERNEL_OK")
</pallas_src>

<mosaic_0001>
module attributes {stable_mosaic.version = 11 : i64} {
  func.func @_fused_cnn_kernel(%arg0: i32, %arg1: memref<2x1024xbf16, #tpu.memory_space<vmem>>, %arg2: memref<1024x512xbf16, #tpu.memory_space<vmem>>, %arg3: memref<1x512xf32, #tpu.memory_space<vmem>>, %arg4: memref<512x256xbf16, #tpu.memory_space<vmem>>, %arg5: memref<1x256xf32, #tpu.memory_space<vmem>>, %arg6: memref<256x128xbf16, #tpu.memory_space<vmem>>, %arg7: memref<1x128xf32, #tpu.memory_space<vmem>>, %arg8: memref<128x64xbf16, #tpu.memory_space<vmem>>, %arg9: memref<1x64xf32, #tpu.memory_space<vmem>>, %arg10: memref<64x128xbf16, #tpu.memory_space<vmem>>, %arg11: memref<1x128xf32, #tpu.memory_space<vmem>>, %arg12: memref<128x10xbf16, #tpu.memory_space<vmem>>, %arg13: memref<1x10xf32, #tpu.memory_space<vmem>>, %arg14: memref<2x10xf32, #tpu.memory_space<vmem>>) attributes {dimension_semantics = [#tpu.dimension_semantics<arbitrary>], iteration_bounds = array<i64: 1>, scalar_prefetch = 0 : i64, scratch_operands = 0 : i64, tpu.core_type = #tpu.core_type<tc>, window_params = [{pipeline_mode = #tpu.pipeline_mode<synchronous>, transform_indices = @transform_0, window_bounds = array<i64: 2, 1024>}, {pipeline_mode = #tpu.pipeline_mode<synchronous>, transform_indices = @transform_1, window_bounds = array<i64: 1024, 512>}, {pipeline_mode = #tpu.pipeline_mode<synchronous>, transform_indices = @transform_2, window_bounds = array<i64: 1, 512>}, {pipeline_mode = #tpu.pipeline_mode<synchronous>, transform_indices = @transform_3, window_bounds = array<i64: 512, 256>}, {pipeline_mode = #tpu.pipeline_mode<synchronous>, transform_indices = @transform_4, window_bounds = array<i64: 1, 256>}, {pipeline_mode = #tpu.pipeline_mode<synchronous>, transform_indices = @transform_5, window_bounds = array<i64: 256, 128>}, {pipeline_mode = #tpu.pipeline_mode<synchronous>, transform_indices = @transform_6, window_bounds = array<i64: 1, 128>}, {pipeline_mode = #tpu.pipeline_mode<synchronous>, transform_indices = @transform_7, window_bounds = array<i64: 128, 64>}, {pipeline_mode = #tpu.pipeline_mode<synchronous>, transform_indices = @transform_8, window_bounds = array<i64: 1, 64>}, {pipeline_mode = #tpu.pipeline_mode<synchronous>, transform_indices = @transform_9, window_bounds = array<i64: 64, 128>}, {pipeline_mode = #tpu.pipeline_mode<synchronous>, transform_indices = @transform_10, window_bounds = array<i64: 1, 128>}, {pipeline_mode = #tpu.pipeline_mode<synchronous>, transform_indices = @transform_11, window_bounds = array<i64: 128, 10>}, {pipeline_mode = #tpu.pipeline_mode<synchronous>, transform_indices = @transform_12, window_bounds = array<i64: 1, 10>}, {pipeline_mode = #tpu.pipeline_mode<synchronous>, transform_indices = @transform_13, window_bounds = array<i64: 2, 10>}]} {
    %c0 = arith.constant 0 : index
    %c0_0 = arith.constant 0 : index
    %0 = vector.load %arg1[%c0, %c0_0] : memref<2x1024xbf16, #tpu.memory_space<vmem>>, vector<2x1024xbf16>
    %c0_1 = arith.constant 0 : index
    %c0_2 = arith.constant 0 : index
    %1 = vector.load %arg2[%c0_1, %c0_2] : memref<1024x512xbf16, #tpu.memory_space<vmem>>, vector<1024x512xbf16>
    %cst = arith.constant dense<0.000000e+00> : vector<2x512xf32>
    %2 = tpu.matmul %0, %1, %cst {dimension_numbers = #tpu.dot_dimension_numbers<[1], [0], [0], [1], [0, 0, 1, 1], [], []>} : vector<2x1024xbf16>, vector<1024x512xbf16>, vector<2x512xf32> -> vector<2x512xf32>
    %c0_3 = arith.constant 0 : index
    %c0_4 = arith.constant 0 : index
    %3 = vector.load %arg3[%c0_3, %c0_4] : memref<1x512xf32, #tpu.memory_space<vmem>>, vector<1x512xf32>
    %4 = vector.broadcast %3 : vector<1x512xf32> to vector<2x512xf32>
    %5 = arith.addf %2, %4 : vector<2x512xf32>
    %cst_5 = arith.constant 0.000000e+00 : f32
    %6 = vector.broadcast %cst_5 : f32 to vector<2x512xf32>
    %7 = arith.maximumf %5, %6 : vector<2x512xf32>
    %8 = arith.truncf %7 : vector<2x512xf32> to vector<2x512xbf16>
    %c0_6 = arith.constant 0 : index
    %c0_7 = arith.constant 0 : index
    %9 = vector.load %arg4[%c0_6, %c0_7] : memref<512x256xbf16, #tpu.memory_space<vmem>>, vector<512x256xbf16>
    %cst_8 = arith.constant dense<0.000000e+00> : vector<2x256xf32>
    %10 = tpu.matmul %8, %9, %cst_8 {dimension_numbers = #tpu.dot_dimension_numbers<[1], [0], [0], [1], [0, 0, 1, 1], [], []>} : vector<2x512xbf16>, vector<512x256xbf16>, vector<2x256xf32> -> vector<2x256xf32>
    %c0_9 = arith.constant 0 : index
    %c0_10 = arith.constant 0 : index
    %11 = vector.load %arg5[%c0_9, %c0_10] : memref<1x256xf32, #tpu.memory_space<vmem>>, vector<1x256xf32>
    %12 = vector.broadcast %11 : vector<1x256xf32> to vector<2x256xf32>
    %13 = arith.addf %10, %12 : vector<2x256xf32>
    %cst_11 = arith.constant 0.000000e+00 : f32
    %14 = vector.broadcast %cst_11 : f32 to vector<2x256xf32>
    %15 = arith.maximumf %13, %14 : vector<2x256xf32>
    %16 = arith.truncf %15 : vector<2x256xf32> to vector<2x256xbf16>
    %c0_12 = arith.constant 0 : index
    %c0_13 = arith.constant 0 : index
    %17 = vector.load %arg6[%c0_12, %c0_13] : memref<256x128xbf16, #tpu.memory_space<vmem>>, vector<256x128xbf16>
    %cst_14 = arith.constant dense<0.000000e+00> : vector<2x128xf32>
    %18 = tpu.matmul %16, %17, %cst_14 {dimension_numbers = #tpu.dot_dimension_numbers<[1], [0], [0], [1], [0, 0, 1, 1], [], []>} : vector<2x256xbf16>, vector<256x128xbf16>, vector<2x128xf32> -> vector<2x128xf32>
    %c0_15 = arith.constant 0 : index
    %c0_16 = arith.constant 0 : index
    %19 = vector.load %arg7[%c0_15, %c0_16] : memref<1x128xf32, #tpu.memory_space<vmem>>, vector<1x128xf32>
    %20 = vector.broadcast %19 : vector<1x128xf32> to vector<2x128xf32>
    %21 = arith.addf %18, %20 : vector<2x128xf32>
    %cst_17 = arith.constant 0.000000e+00 : f32
    %22 = vector.broadcast %cst_17 : f32 to vector<2x128xf32>
    %23 = arith.maximumf %21, %22 : vector<2x128xf32>
    %24 = arith.truncf %23 : vector<2x128xf32> to vector<2x128xbf16>
    %c0_18 = arith.constant 0 : index
    %c0_19 = arith.constant 0 : index
    %25 = vector.load %arg8[%c0_18, %c0_19] : memref<128x64xbf16, #tpu.memory_space<vmem>>, vector<128x64xbf16>
    %cst_20 = arith.constant dense<0.000000e+00> : vector<2x64xf32>
    %26 = tpu.matmul %24, %25, %cst_20 {dimension_numbers = #tpu.dot_dimension_numbers<[1], [0], [0], [1], [0, 0, 1, 1], [], []>} : vector<2x128xbf16>, vector<128x64xbf16>, vector<2x64xf32> -> vector<2x64xf32>
    %c0_21 = arith.constant 0 : index
    %c0_22 = arith.constant 0 : index
    %27 = vector.load %arg9[%c0_21, %c0_22] : memref<1x64xf32, #tpu.memory_space<vmem>>, vector<1x64xf32>
    %28 = vector.broadcast %27 : vector<1x64xf32> to vector<2x64xf32>
    %29 = arith.addf %26, %28 : vector<2x64xf32>
    %cst_23 = arith.constant 0.000000e+00 : f32
    %30 = vector.broadcast %cst_23 : f32 to vector<2x64xf32>
    %31 = arith.maximumf %29, %30 : vector<2x64xf32>
    %32 = arith.truncf %31 : vector<2x64xf32> to vector<2x64xbf16>
    %c0_24 = arith.constant 0 : index
    %c0_25 = arith.constant 0 : index
    %33 = vector.load %arg10[%c0_24, %c0_25] : memref<64x128xbf16, #tpu.memory_space<vmem>>, vector<64x128xbf16>
    %cst_26 = arith.constant dense<0.000000e+00> : vector<2x128xf32>
    %34 = tpu.matmul %32, %33, %cst_26 {dimension_numbers = #tpu.dot_dimension_numbers<[1], [0], [0], [1], [0, 0, 1, 1], [], []>} : vector<2x64xbf16>, vector<64x128xbf16>, vector<2x128xf32> -> vector<2x128xf32>
    %c0_27 = arith.constant 0 : index
    %c0_28 = arith.constant 0 : index
    %35 = vector.load %arg11[%c0_27, %c0_28] : memref<1x128xf32, #tpu.memory_space<vmem>>, vector<1x128xf32>
    %36 = vector.broadcast %35 : vector<1x128xf32> to vector<2x128xf32>
    %37 = arith.addf %34, %36 : vector<2x128xf32>
    %cst_29 = arith.constant 0.000000e+00 : f32
    %38 = vector.broadcast %cst_29 : f32 to vector<2x128xf32>
    %39 = arith.maximumf %37, %38 : vector<2x128xf32>
    %40 = arith.truncf %39 : vector<2x128xf32> to vector<2x128xbf16>
    %c0_30 = arith.constant 0 : index
    %c0_31 = arith.constant 0 : index
    %41 = vector.load %arg12[%c0_30, %c0_31] : memref<128x10xbf16, #tpu.memory_space<vmem>>, vector<128x10xbf16>
    %cst_32 = arith.constant dense<0.000000e+00> : vector<2x10xf32>
    %42 = tpu.matmul %40, %41, %cst_32 {dimension_numbers = #tpu.dot_dimension_numbers<[1], [0], [0], [1], [0, 0, 1, 1], [], []>} : vector<2x128xbf16>, vector<128x10xbf16>, vector<2x10xf32> -> vector<2x10xf32>
    %c0_33 = arith.constant 0 : index
    %c0_34 = arith.constant 0 : index
    %43 = vector.load %arg13[%c0_33, %c0_34] : memref<1x10xf32, #tpu.memory_space<vmem>>, vector<1x10xf32>
    %44 = vector.broadcast %43 : vector<1x10xf32> to vector<2x10xf32>
    %45 = arith.addf %42, %44 : vector<2x10xf32>
    %c0_35 = arith.constant 0 : index
    %c0_36 = arith.constant 0 : index
    %46 = vector.load %arg14[%c0_35, %c0_36] : memref<2x10xf32, #tpu.memory_space<vmem>>, vector<2x10xf32>
    tpu.vector_store %arg14[%c0_35, %c0_36], %45 {strides = array<i32>} : memref<2x10xf32, #tpu.memory_space<vmem>>, vector<2x10xf32>,
    return
  }
  func.func @transform_0(%arg0: i32) -> (i32, i32) {
    %c0_i32 = arith.constant 0 : i32
    %c0_i32_0 = arith.constant 0 : i32
    %c0_i32_1 = arith.constant 0 : i32
    return %c0_i32, %c0_i32_0 : i32, i32
  }
  func.func @transform_1(%arg0: i32) -> (i32, i32) {
    %c0_i32 = arith.constant 0 : i32
    %c0_i32_0 = arith.constant 0 : i32
    %c0_i32_1 = arith.constant 0 : i32
    return %c0_i32, %c0_i32_0 : i32, i32
  }
  func.func @transform_2(%arg0: i32) -> (i32, i32) {
    %c0_i32 = arith.constant 0 : i32
    %c0_i32_0 = arith.constant 0 : i32
    %c0_i32_1 = arith.constant 0 : i32
    return %c0_i32, %c0_i32_0 : i32, i32
  }
  func.func @transform_3(%arg0: i32) -> (i32, i32) {
    %c0_i32 = arith.constant 0 : i32
    %c0_i32_0 = arith.constant 0 : i32
    %c0_i32_1 = arith.constant 0 : i32
    return %c0_i32, %c0_i32_0 : i32, i32
  }
  func.func @transform_4(%arg0: i32) -> (i32, i32) {
    %c0_i32 = arith.constant 0 : i32
    %c0_i32_0 = arith.constant 0 : i32
    %c0_i32_1 = arith.constant 0 : i32
    return %c0_i32, %c0_i32_0 : i32, i32
  }
  func.func @transform_5(%arg0: i32) -> (i32, i32) {
    %c0_i32 = arith.constant 0 : i32
    %c0_i32_0 = arith.constant 0 : i32
    %c0_i32_1 = arith.constant 0 : i32
    return %c0_i32, %c0_i32_0 : i32, i32
  }
  func.func @transform_6(%arg0: i32) -> (i32, i32) {
    %c0_i32 = arith.constant 0 : i32
    %c0_i32_0 = arith.constant 0 : i32
    %c0_i32_1 = arith.constant 0 : i32
    return %c0_i32, %c0_i32_0 : i32, i32
  }
  func.func @transform_7(%arg0: i32) -> (i32, i32) {
    %c0_i32 = arith.constant 0 : i32
    %c0_i32_0 = arith.constant 0 : i32
    %c0_i32_1 = arith.constant 0 : i32
    return %c0_i32, %c0_i32_0 : i32, i32
  }
  func.func @transform_8(%arg0: i32) -> (i32, i32) {
    %c0_i32 = arith.constant 0 : i32
    %c0_i32_0 = arith.constant 0 : i32
    %c0_i32_1 = arith.constant 0 : i32
    return %c0_i32, %c0_i32_0 : i32, i32
  }
  func.func @transform_9(%arg0: i32) -> (i32, i32) {
    %c0_i32 = arith.constant 0 : i32
    %c0_i32_0 = arith.constant 0 : i32
    %c0_i32_1 = arith.constant 0 : i32
    return %c0_i32, %c0_i32_0 : i32, i32
  }
  func.func @transform_10(%arg0: i32) -> (i32, i32) {
    %c0_i32 = arith.constant 0 : i32
    %c0_i32_0 = arith.constant 0 : i32
    %c0_i32_1 = arith.constant 0 : i32
    return %c0_i32, %c0_i32_0 : i32, i32
  }
  func.func @transform_11(%arg0: i32) -> (i32, i32) {
    %c0_i32 = arith.constant 0 : i32
    %c0_i32_0 = arith.constant 0 : i32
    %c0_i32_1 = arith.constant 0 : i32
    return %c0_i32, %c0_i32_0 : i32, i32
  }
  func.func @transform_12(%arg0: i32) -> (i32, i32) {
    %c0_i32 = arith.constant 0 : i32
    %c0_i32_0 = arith.constant 0 : i32
    %c0_i32_1 = arith.constant 0 : i32
    return %c0_i32, %c0_i32_0 : i32, i32
  }
  func.func @transform_13(%arg0: i32) -> (i32, i32) {
    %c0_i32 = arith.constant 0 : i32
    %c0_i32_0 = arith.constant 0 : i32
    %c0_i32_1 = arith.constant 0 : i32
    return %c0_i32, %c0_i32_0 : i32, i32
  }
}

</mosaic_0001>

<bundles_post_ra>
// kernel: simple_cnn_forward_fn.1
= control target key start
LH: loop header
LB: loop body
LE: loop exit
PB: predicated region body
PF: predicated region fallthrough
CT: control target
= control target key end

     0   :  { %18 = vsyncpa [#allocation3], 0  ;;  %s4527_s0 = inlined_call_operand.vmem [shape: bf16[2,1024], index: 0, kind: input, shape index: {}]   ;;  %s4528_s1 = inlined_call_operand.hbm [shape: bf16[1024,512], index: 1, kind: input, shape index: {}]   ;;  %s4529_s2 = inlined_call_operand.vmem [shape: f32[1,512], index: 2, kind: input, shape index: {}]   ;;  %s4530_s3 = inlined_call_operand.vmem [shape: bf16[512,256], index: 3, kind: input, shape index: {}]   ;;  %s4531_s4 = inlined_call_operand.vmem [shape: f32[1,256], index: 4, kind: input, shape index: {}]   ;;  %s4532_s5 = inlined_call_operand.vmem [shape: bf16[256,128], index: 5, kind: input, shape index: {}]   ;;  %s4533_s6 = inlined_call_operand.vmem [shape: f32[1,128], index: 6, kind: input, shape index: {}]   ;;  %s4534_s7 = inlined_call_operand.vmem [shape: bf16[128,64], index: 7, kind: input, shape index: {}]   ;;  %s4535_s8 = inlined_call_operand.vmem [shape: f32[1,64], index: 8, kind: input, shape index: {}]   ;;  %s4536_s9 = inlined_call_operand.vmem [shape: bf16[64,128], index: 9, kind: input, shape index: {}]   ;;  %s4537_s10 = inlined_call_operand.vmem [shape: f32[1,128], index: 10, kind: input, shape index: {}]   ;;  %s4538_s11 = inlined_call_operand.vmem [shape: bf16[128,10], index: 11, kind: input, shape index: {}]   ;;  %s4539_s12 = inlined_call_operand.vmem [shape: f32[1,10], index: 12, kind: input, shape index: {}]   ;;  %s4540_s13 = inlined_call_operand.hbm [shape: f32[2,10], index: 13, kind: output, shape index: {}]  }
   0x1   :  { %19 = vsyncpa [#allocation4], 0  ;;  %s4024_s25 = smov [#allocation2]  }
   0x2   :  { %s27_s26 = sshll.u32 %s4024_s25, 4  ;;  %s28_s26 = int_to_ptr.vmem [resolvable:$true] %s27_s26 }
   0x3   :  { %s3988_s27 = scalar_lea.vmem %s28_s26, 32768  ;;  %p3993_p1 = scmp.lt.s32.totalorder %s28_s26, %s28_s26 }
   0x4   :  { %p3989_p0 = scmp.ne.s32.totalorder %s28_s26, %s3988_s27  ;;  %p3994_p2 = scmp.lt.s32.totalorder %s3988_s27, %s3988_s27 }
   0x6   :  { %p3995_p3 = por %p3994_p2, %p3993_p1 }
   0x8   :  { %p3996_p4 = pnand %p3995_p3, %p3989_p0 }
   0xa   :  { %3999 = shalt.err (!%p3996_p4)
}
   0xb   :  { %s4025_s28 = smov 256   ;;  %s4026_s29 = smov 16  }
   0xc   :  { %33 = dma.hbm_to_vmem [thread:$0]  %s4528_s1, 32768, %s28_s26, [#allocation3], %s4025_s28, %s4025_s28, %s4026_s29  }
   0xd   :  { %4020 = dma.done.wait [#allocation3], 32768  }
   0xe   :  { %4021 = vsyncadd [#allocation3], 4294934528  ;;  %v3463_v0 = vld [vmem:[#allocation2 + $0xe4] ss:$16 sps:$4 sm:$0xff]   ;;  %v3467_v2 = vld [vmem:[#allocation2 + $0xe0] ss:$16 sps:$4 sm:$0xff]   ;;  %v319_v36 = vlaneseq }
   0xf   :  { %v3465_v1 = vld [vmem:[#allocation2 + $0x2e4] ss:$16 sps:$4 sm:$0xff]   ;;  %1677 = vmatprep.subr.bf16.mxu0 %v3463_v0  ;;  %v3468_v3 = vld [vmem:[#allocation2 + $0x2e0] ss:$16 sps:$4 sm:$0xff]   ;;  %v4027_v37 = vmov 1966171168  }
  0x10   :  { %1718 = vmatprep.subr.bf16.mxu1 %v3465_v1  ;;  %v3469_v4 = vld [vmem:[#allocation2 + $0xc4] ss:$16 sps:$4 sm:$0xff]   ;;  %1678 = vmatpush1.bf16.msra.mxu0 %v3467_v2  ;;  %v3473_v6 = vld [vmem:[#allocation2 + $0xc0] ss:$16 sps:$4 sm:$0xff]   ;;  %v342_v38 = vunpack.c.l.s4 %v4027_v37  ;;  %v4104_v42 = vshrl.u32 %v319_v36, 7  ;;  %vm4029_vm0 = vmmov 0  }
  0x11   :  { %1719 = vmatpush1.bf16.msra.mxu1 %v3468_v3  ;;  %v3471_v5 = vld [vmem:[#allocation2 + $0x2c4] ss:$16 sps:$4 sm:$0xff]   ;;  %1679 = vmatprep.subr.bf16.mxu0 %v3469_v4  ;;  %v3474_v7 = vld [vmem:[#allocation2 + $0x2c0] ss:$16 sps:$4 sm:$0xff]   ;;  %vm2824_vm1 = vcmask 523264   ;;  %s4030_s19 = smov [#allocation5]  }
  0x12   :  { %1720 = vmatprep.subr.bf16.mxu1 %v3471_v5  ;;  %v3475_v8 = vld [vmem:[#allocation2 + $0xa4] ss:$16 sps:$4 sm:$0xff]   ;;  %v3479_v10 = vld [vmem:[#allocation2 + $0xa0] ss:$16 sps:$4 sm:$0xff]   ;;  %v343_v43 = vunpack.c.0.s8 %v342_v38  ;;  %s2989_s20 = sshll.u32 %s4030_s19, 4  ;;  %vm2981_vm2 = vcmask 74752   ;;  %s2990_s20 = int_to_ptr.vmem [resolvable:$true] %s2989_s20 }
  0x13   :  { %v3477_v9 = vld [vmem:[#allocation2 + $0x2a4] ss:$16 sps:$4 sm:$0xff]   ;;  %v3480_v11 = vld [vmem:[#allocation2 + $0x2a0] ss:$16 sps:$4 sm:$0xff]   ;;  %p4005_p6 = scmp.lt.s32.totalorder %s2990_s20, %s2990_s20 }
  0x14   :  { %1680 = vmatpush1.bf16.msra.mxu0 %v3473_v6  ;;  %v3481_v12 = vld [vmem:[#allocation2 + $0x84] ss:$16 sps:$4 sm:$0xff]   ;;  %v3485_v14 = vld [vmem:[#allocation2 + $0x80] ss:$16 sps:$4 sm:$0xff]   ;;  %v346_v49 = vsub.s32 %v343_v43, %v4104_v42 }
  0x15   :  { %1721 = vmatpush1.bf16.msra.mxu1 %v3474_v7  ;;  %1681 = vmatprep.subr.bf16.mxu0 %v3475_v8  ;;  %v3483_v13 = vld [vmem:[#allocation2 + $0x284] ss:$16 sps:$4 sm:$0xff]   ;;  %v3486_v15 = vld [vmem:[#allocation2 + $0x280] ss:$16 sps:$4 sm:$0xff]  }
  0x16   :  { %1722 = vmatprep.subr.bf16.mxu1 %v3477_v9  ;;  %v3487_v16 = vld [vmem:[#allocation2 + $0x64] ss:$16 sps:$4 sm:$0xff]   ;;  %v3491_v18 = vld [vmem:[#allocation2 + $0x60] ss:$16 sps:$4 sm:$0xff]  }
  0x17   :  { %v3489_v17 = vld [vmem:[#allocation2 + $0x264] ss:$16 sps:$4 sm:$0xff]   ;;  %v3492_v19 = vld [vmem:[#allocation2 + $0x260] ss:$16 sps:$4 sm:$0xff]  }
  0x18   :  { %1682 = vmatpush1.bf16.msra.mxu0 %v3479_v10  ;;  %v3493_v20 = vld [vmem:[#allocation2 + $0x44] ss:$16 sps:$4 sm:$0xff]   ;;  %v3497_v22 = vld [vmem:[#allocation2 + $0x40] ss:$16 sps:$4 sm:$0xff]  }
  0x19   :  { %1723 = vmatpush1.bf16.msra.mxu1 %v3480_v11  ;;  %1683 = vmatprep.subr.bf16.mxu0 %v3481_v12  ;;  %v3495_v21 = vld [vmem:[#allocation2 + $0x244] ss:$16 sps:$4 sm:$0xff]   ;;  %v3498_v23 = vld [vmem:[#allocation2 + $0x240] ss:$16 sps:$4 sm:$0xff]  }
  0x1a   :  { %1724 = vmatprep.subr.bf16.mxu1 %v3483_v13  ;;  %v3499_v24 = vld [vmem:[#allocation2 + $0x24] ss:$16 sps:$4 sm:$0xff]   ;;  %v3503_v26 = vld [vmem:[#allocation2 + $0x20] ss:$16 sps:$4 sm:$0xff]  }
  0x1b   :  { %v3501_v25 = vld [vmem:[#allocation2 + $0x224] ss:$16 sps:$4 sm:$0xff]   ;;  %v3504_v27 = vld [vmem:[#allocation2 + $0x220] ss:$16 sps:$4 sm:$0xff]  }
  0x1c   :  { %1684 = vmatpush1.bf16.msra.mxu0 %v3485_v14  ;;  %v3505_v28 = vld [vmem:[#allocation2 + $0x4] ss:$16 sps:$4 sm:$0xff]   ;;  %v3509_v30 = vld [vmem:[#allocation2] ss:$16 sps:$4 sm:$0xff]  }
  0x1d   :  { %1725 = vmatpush1.bf16.msra.mxu1 %v3486_v15  ;;  %1685 = vmatprep.subr.bf16.mxu0 %v3487_v16  ;;  %v3507_v29 = vld [vmem:[#allocation2 + $0x204] ss:$16 sps:$4 sm:$0xff]   ;;  %v3510_v31 = vld [vmem:[#allocation2 + $0x200] ss:$16 sps:$4 sm:$0xff]  }
  0x1e   :  { %1726 = vmatprep.subr.bf16.mxu1 %v3489_v17  ;;  %v3511_v32 = vld [vmem:[#allocation2 + $0x1e4] ss:$16 sps:$4 sm:$0xff]   ;;  %v3515_v34 = vld [vmem:[#allocation2 + $0x1e0] ss:$16 sps:$4 sm:$0xff]  }
  0x1f   :  { %v3513_v33 = vld [vmem:[#allocation2 + $0x3e4] ss:$16 sps:$4 sm:$0xff]   ;;  %v3516_v35 = vld [vmem:[#allocation2 + $0x3e0] ss:$16 sps:$4 sm:$0xff]  }
  0x20   :  { %1686 = vmatpush1.bf16.msra.mxu0 %v3491_v18  ;;  %v3517_v39 = vld [vmem:[#allocation2 + $0x1c4] ss:$16 sps:$4 sm:$0xff]   ;;  %v3521_v41 = vld [vmem:[#allocation2 + $0x1c0] ss:$16 sps:$4 sm:$0xff]  }
  0x21   :  { %1727 = vmatpush1.bf16.msra.mxu1 %v3492_v19  ;;  %1687 = vmatprep.subr.bf16.mxu0 %v3493_v20  ;;  %v3519_v40 = vld [vmem:[#allocation2 + $0x3c4] ss:$16 sps:$4 sm:$0xff]   ;;  %v3522_v44 = vld [vmem:[#allocation2 + $0x3c0] ss:$16 sps:$4 sm:$0xff]  }
  0x22   :  { %1728 = vmatprep.subr.bf16.mxu1 %v3495_v21  ;;  %v3523_v45 = vld [vmem:[#allocation2 + $0x1a4] ss:$16 sps:$4 sm:$0xff]   ;;  %v3527_v47 = vld [vmem:[#allocation2 + $0x1a0] ss:$16 sps:$4 sm:$0xff]  }
  0x23   :  { %v3525_v46 = vld [vmem:[#allocation2 + $0x3a4] ss:$16 sps:$4 sm:$0xff]   ;;  %v3528_v48 = vld [vmem:[#allocation2 + $0x3a0] ss:$16 sps:$4 sm:$0xff]  }
  0x24   :  { %1688 = vmatpush1.bf16.msra.mxu0 %v3497_v22  ;;  %v3529_v50 = vld [vmem:[#allocation2 + $0x184] ss:$16 sps:$4 sm:$0xff]   ;;  %v3533_v53 = vld [vmem:[#allocation2 + $0x180] ss:$16 sps:$4 sm:$0xff]  }
  0x25   :  { %1729 = vmatpush1.bf16.msra.mxu1 %v3498_v23  ;;  %1689 = vmatprep.subr.bf16.mxu0 %v3499_v24  ;;  %v3531_v51 = vld [vmem:[#allocation2 + $0x384] ss:$16 sps:$4 sm:$0xff]   ;;  %v3534_v56 = vld [vmem:[#allocation2 + $0x380] ss:$16 sps:$4 sm:$0xff]  }
  0x26   :  { %1730 = vmatprep.subr.bf16.mxu1 %v3501_v25  ;;  %v60_v52 = vld [vmem:[%s4527_s0] sm:$0xff] }
  0x27   :  { %v347_v54 = vrot.slane %v60_v52, %v346_v49  ;;  %v340_v55 = vcombine.high %v60_v52, %v60_v52  ;;  %v3535_v57 = vld [vmem:[#allocation2 + $0x164] ss:$16 sps:$4 sm:$0xff]   ;;  %v3539_v61 = vld [vmem:[#allocation2 + $0x160] ss:$16 sps:$4 sm:$0xff]  }
  0x28   :  { %1690 = vmatpush1.bf16.msra.mxu0 %v3503_v26  ;;  %v3537_v58 = vld [vmem:[#allocation2 + $0x364] ss:$16 sps:$4 sm:$0xff]   ;;  %v3540_v0 = vld [vmem:[#allocation2 + $0x360] ss:$16 sps:$4 sm:$0xff]  }
  0x29   :  { %1731 = vmatpush1.bf16.msra.mxu1 %v3504_v27  ;;  %1691 = vmatprep.subr.bf16.mxu0 %v3505_v28  ;;  %v355_v59 = vcombine.high %v347_v54, %v347_v54  ;;  %v354_v60 = vrot.slane %v340_v55, %v346_v49  ;;  %v3541_v1 = vld [vmem:[#allocation2 + $0x144] ss:$16 sps:$4 sm:$0xff]   ;;  %v3545_v4 = vld [vmem:[#allocation2 + $0x140] ss:$16 sps:$4 sm:$0xff]   ;;  %v4120_v14 = vrot.slane %v347_v54, %v346_v49 }
  0x2a   :  { %1732 = vmatprep.subr.bf16.mxu1 %v3507_v29  ;;  %v3543_v2 = vld [vmem:[#allocation2 + $0x344] ss:$16 sps:$4 sm:$0xff]   ;;  %v3546_v5 = vld [vmem:[#allocation2 + $0x340] ss:$16 sps:$4 sm:$0xff]  }
  0x2b   :  { %v4110_v62 = vrot.slane %v355_v59, %v346_v49  ;;  %v4112_v63 = vrot.slane %v354_v60, %v346_v49  ;;  %v3547_v6 = vld [vmem:[#allocation2 + $0x124] ss:$16 sps:$4 sm:$0xff]   ;;  %v3551_v8 = vld [vmem:[#allocation2 + $0x120] ss:$16 sps:$4 sm:$0xff]   ;;  %v356_v12 = vcombine.high %v354_v60, %v354_v60  ;;  %v4126_v19 = vcombine.high %v4120_v14, %v4120_v14 }
  0x2c   :  { %1692 = vmatpush1.bf16.msra.mxu0 %v3509_v30  ;;  %v3549_v7 = vld [vmem:[#allocation2 + $0x324] ss:$16 sps:$4 sm:$0xff]   ;;  %v3552_v9 = vld [vmem:[#allocation2 + $0x320] ss:$16 sps:$4 sm:$0xff]  }
  0x2d   :  { %1733 = vmatpush1.bf16.msra.mxu1 %v3510_v31  ;;  %1693 = vmatprep.subr.bf16.mxu0 %v3511_v32  ;;  %v4116_v3 = vcombine.high %v4110_v62, %v4110_v62  ;;  %v3553_v10 = vld [vmem:[#allocation2 + $0x104] ss:$16 sps:$4 sm:$0xff]   ;;  %v3557_v13 = vld [vmem:[#allocation2 + $0x100] ss:$16 sps:$4 sm:$0xff]   ;;  %v4122_v18 = vrot.slane %v356_v12, %v346_v49 }
  0x2e   :  { %1734 = vmatprep.subr.bf16.mxu1 %v3513_v33  ;;  %1709 = vmatprep.mubr.bf16.mxu0 %v4110_v62  ;;  %v3555_v11 = vld [vmem:[#allocation2 + $0x304] ss:$16 sps:$4 sm:$0xff]   ;;  %v3558_v15 = vld [vmem:[#allocation2 + $0x300] ss:$16 sps:$4 sm:$0xff]  }
  0x2f   :  { %1750 = vmatprep.mubr.bf16.mxu1 %v4116_v3  ;;  %v3561_v16 = vld [vmem:[#allocation2 + $0x4e4] ss:$16 sps:$4 sm:$0xff]   ;;  %v3559_v20 = vld [vmem:[#allocation2 + $0x4e0] ss:$16 sps:$4 sm:$0xff]   ;;  %v4130_v24 = vcombine.high %v4122_v18, %v4122_v18 }
  0x30   :  { %1694 = vmatpush2.bf16.msra.mxu0 %v3515_v34  ;;  %v3564_v17 = vld [vmem:[#allocation2 + $0x6e4] ss:$16 sps:$4 sm:$0xff]   ;;  %v3562_v21 = vld [vmem:[#allocation2 + $0x6e0] ss:$16 sps:$4 sm:$0xff]  }
  0x31   :  { %1735 = vmatpush2.bf16.msra.mxu1 %v3516_v35  ;;  %1695 = vmatprep.subr.bf16.mxu0 %v3517_v39  ;;  %v3567_v22 = vld [vmem:[#allocation2 + $0x4c4] ss:$16 sps:$4 sm:$0xff]   ;;  %v3565_v25 = vld [vmem:[#allocation2 + $0x4c0] ss:$16 sps:$4 sm:$0xff]  }
  0x32   :  { %1736 = vmatprep.subr.bf16.mxu1 %v3519_v40  ;;  %v3570_v23 = vld [vmem:[#allocation2 + $0x6c4] ss:$16 sps:$4 sm:$0xff]   ;;  %v3568_v26 = vld [vmem:[#allocation2 + $0x6c0] ss:$16 sps:$4 sm:$0xff]  }
  0x33   :  { %v3573_v27 = vld [vmem:[#allocation2 + $0x4a4] ss:$16 sps:$4 sm:$0xff]   ;;  %v3571_v29 = vld [vmem:[#allocation2 + $0x4a0] ss:$16 sps:$4 sm:$0xff]  }
  0x34   :  { %1696 = vmatpush2.bf16.msra.mxu0 %v3521_v41  ;;  %v3576_v28 = vld [vmem:[#allocation2 + $0x6a4] ss:$16 sps:$4 sm:$0xff]   ;;  %v3574_v30 = vld [vmem:[#allocation2 + $0x6a0] ss:$16 sps:$4 sm:$0xff]  }
  0x35   :  { %1737 = vmatpush2.bf16.msra.mxu1 %v3522_v44  ;;  %1697 = vmatprep.subr.bf16.mxu0 %v3523_v45  ;;  %v3579_v31 = vld [vmem:[#allocation2 + $0x484] ss:$16 sps:$4 sm:$0xff]   ;;  %v3577_v33 = vld [vmem:[#allocation2 + $0x480] ss:$16 sps:$4 sm:$0xff]  }
  0x36   :  { %1738 = vmatprep.subr.bf16.mxu1 %v3525_v46  ;;  %v3582_v32 = vld [vmem:[#allocation2 + $0x684] ss:$16 sps:$4 sm:$0xff]   ;;  %v3580_v34 = vld [vmem:[#allocation2 + $0x680] ss:$16 sps:$4 sm:$0xff]  }
  0x37   :  { %v3585_v35 = vld [vmem:[#allocation2 + $0x464] ss:$16 sps:$4 sm:$0xff]   ;;  %v3583_v37 = vld [vmem:[#allocation2 + $0x460] ss:$16 sps:$4 sm:$0xff]  }
  0x38   :  { %1698 = vmatpush2.bf16.msra.mxu0 %v3527_v47  ;;  %v3588_v36 = vld [vmem:[#allocation2 + $0x664] ss:$16 sps:$4 sm:$0xff]   ;;  %v3586_v38 = vld [vmem:[#allocation2 + $0x660] ss:$16 sps:$4 sm:$0xff]  }
  0x39   :  { %1739 = vmatpush2.bf16.msra.mxu1 %v3528_v48  ;;  %1699 = vmatprep.subr.bf16.mxu0 %v3529_v50  ;;  %v3591_v39 = vld [vmem:[#allocation2 + $0x444] ss:$16 sps:$4 sm:$0xff]   ;;  %v3589_v41 = vld [vmem:[#allocation2 + $0x440] ss:$16 sps:$4 sm:$0xff]  }
  0x3a   :  { %1740 = vmatprep.subr.bf16.mxu1 %v3531_v51  ;;  %v3594_v40 = vld [vmem:[#allocation2 + $0x644] ss:$16 sps:$4 sm:$0xff]   ;;  %v3592_v43 = vld [vmem:[#allocation2 + $0x640] ss:$16 sps:$4 sm:$0xff]  }
  0x3b   :  { %v3597_v44 = vld [vmem:[#allocation2 + $0x424] ss:$16 sps:$4 sm:$0xff]   ;;  %v3595_v46 = vld [vmem:[#allocation2 + $0x420] ss:$16 sps:$4 sm:$0xff]  }
  0x3c   :  { %1700 = vmatpush2.bf16.msra.mxu0 %v3533_v53  ;;  %v3600_v45 = vld [vmem:[#allocation2 + $0x624] ss:$16 sps:$4 sm:$0xff]   ;;  %v3598_v47 = vld [vmem:[#allocation2 + $0x620] ss:$16 sps:$4 sm:$0xff]  }
  0x3d   :  { %1741 = vmatpush2.bf16.msra.mxu1 %v3534_v56  ;;  %1701 = vmatprep.subr.bf16.mxu0 %v3535_v57  ;;  %v3603_v48 = vld [vmem:[#allocation2 + $0x404] ss:$16 sps:$4 sm:$0xff]   ;;  %v3601_v50 = vld [vmem:[#allocation2 + $0x400] ss:$16 sps:$4 sm:$0xff]  }
  0x3e   :  { %1742 = vmatprep.subr.bf16.mxu1 %v3537_v58  ;;  %v3606_v49 = vld [vmem:[#allocation2 + $0x604] ss:$16 sps:$4 sm:$0xff]   ;;  %v3604_v51 = vld [vmem:[#allocation2 + $0x600] ss:$16 sps:$4 sm:$0xff]  }
  0x3f   :  { %v3609_v52 = vld [vmem:[#allocation2 + $0x5e4] ss:$16 sps:$4 sm:$0xff]   ;;  %v3607_v54 = vld [vmem:[#allocation2 + $0x5e0] ss:$16 sps:$4 sm:$0xff]  }
  0x40   :  { %1702 = vmatpush2.bf16.msra.mxu0 %v3539_v61  ;;  %v3612_v53 = vld [vmem:[#allocation2 + $0x7e4] ss:$16 sps:$4 sm:$0xff]   ;;  %v3610_v55 = vld [vmem:[#allocation2 + $0x7e0] ss:$16 sps:$4 sm:$0xff]  }
  0x41   :  { %1743 = vmatpush2.bf16.msra.mxu1 %v3540_v0  ;;  %1703 = vmatprep.subr.bf16.mxu0 %v3541_v1  ;;  %v3615_v56 = vld [vmem:[#allocation2 + $0x5c4] ss:$16 sps:$4 sm:$0xff]   ;;  %v3613_v58 = vld [vmem:[#allocation2 + $0x5c0] ss:$16 sps:$4 sm:$0xff]  }
  0x42   :  { %1744 = vmatprep.subr.bf16.mxu1 %v3543_v2  ;;  %v3618_v57 = vld [vmem:[#allocation2 + $0x7c4] ss:$16 sps:$4 sm:$0xff]   ;;  %v3616_v59 = vld [vmem:[#allocation2 + $0x7c0] ss:$16 sps:$4 sm:$0xff]  }
  0x43   :  { %v3621_v60 = vld [vmem:[#allocation2 + $0x5a4] ss:$16 sps:$4 sm:$0xff]   ;;  %v3619_v0 = vld [vmem:[#allocation2 + $0x5a0] ss:$16 sps:$4 sm:$0xff]  }
  0x44   :  { %1704 = vmatpush2.bf16.msra.mxu0 %v3545_v4  ;;  %v3624_v61 = vld [vmem:[#allocation2 + $0x7a4] ss:$16 sps:$4 sm:$0xff]   ;;  %v3622_v1 = vld [vmem:[#allocation2 + $0x7a0] ss:$16 sps:$4 sm:$0xff]  }
  0x45   :  { %1745 = vmatpush2.bf16.msra.mxu1 %v3546_v5  ;;  %1705 = vmatprep.subr.bf16.mxu0 %v3547_v6  ;;  %v3627_v2 = vld [vmem:[#allocation2 + $0x584] ss:$16 sps:$4 sm:$0xff]   ;;  %v3625_v5 = vld [vmem:[#allocation2 + $0x580] ss:$16 sps:$4 sm:$0xff]  }
  0x46   :  { %1746 = vmatprep.subr.bf16.mxu1 %v3549_v7  ;;  %v3630_v4 = vld [vmem:[#allocation2 + $0x784] ss:$16 sps:$4 sm:$0xff]   ;;  %v3628_v6 = vld [vmem:[#allocation2 + $0x780] ss:$16 sps:$4 sm:$0xff]  }
  0x47   :  { %v3633_v7 = vld [vmem:[#allocation2 + $0x564] ss:$16 sps:$4 sm:$0xff]  }
  0x48   :  { %1706 = vmatpush2.bf16.msra.mxu0 %v3551_v8  ;;  %v3636_v8 = vld [vmem:[#allocation2 + $0x764] ss:$16 sps:$4 sm:$0xff]  }
  0x49   :  { %1747 = vmatpush2.bf16.msra.mxu1 %v3552_v9  ;;  %1707 = vmatprep.subr.bf16.mxu0 %v3553_v10  ;;  %v3631_v9 = vld [vmem:[#allocation2 + $0x560] ss:$16 sps:$4 sm:$0xff]   ;;  %v3642_v12 = vld [vmem:[#allocation2 + $0x744] ss:$16 sps:$4 sm:$0xff]  }
  0x4a   :  { %1748 = vmatprep.subr.bf16.mxu1 %v3555_v11  ;;  %v3634_v10 = vld [vmem:[#allocation2 + $0x760] ss:$16 sps:$4 sm:$0xff]   ;;  %v3639_v11 = vld [vmem:[#allocation2 + $0x544] ss:$16 sps:$4 sm:$0xff]  }
  0x4c   :  { %1708 = vmatpush2.bf16.msra.mxu0 %v3557_v13  ;;  %v3637_v13 = vld [vmem:[#allocation2 + $0x540] ss:$16 sps:$4 sm:$0xff]  }
  0x4d   :  { %1749 = vmatpush2.bf16.msra.mxu1 %v3558_v15  ;;  %1759 = vmatprep.subr.bf16.mxu0 %v3561_v16  ;;  %v3640_v15 = vld [vmem:[#allocation2 + $0x740] ss:$16 sps:$4 sm:$0xff]   ;;  %v3645_v16 = vld [vmem:[#allocation2 + $0x524] ss:$16 sps:$4 sm:$0xff]  }
  0x4e   :  { %1800 = vmatprep.subr.bf16.mxu1 %v3564_v17  ;;  %v3648_v17 = vld [vmem:[#allocation2 + $0x724] ss:$16 sps:$4 sm:$0xff]  }
  0x4f   :  { %1710 = vmatmul.mubr.bf16.vlgmr.msra.gmra.mxu0 %v4120_v14 }
  0x50   :  { %1751 = vmatmul.mubr.bf16.vlgmr.msra.gmra.mxu1 %v4126_v19  ;;  %1760 = vmatpush1.bf16.msra.mxu0 %v3559_v20  ;;  %v3643_v20 = vld [vmem:[#allocation2 + $0x520] ss:$16 sps:$4 sm:$0xff]  }
  0x51   :  { %1801 = vmatpush1.bf16.msra.mxu1 %v3562_v21  ;;  %1761 = vmatprep.subr.bf16.mxu0 %v3567_v22  ;;  %v3646_v21 = vld [vmem:[#allocation2 + $0x720] ss:$16 sps:$4 sm:$0xff]   ;;  %v3651_v22 = vld [vmem:[#allocation2 + $0x504] ss:$16 sps:$4 sm:$0xff]  }
  0x52   :  { %1802 = vmatprep.subr.bf16.mxu1 %v3570_v23  ;;  %1791 = vmatprep.mubr.bf16.mxu0 %v4122_v18  ;;  %v3654_v23 = vld [vmem:[#allocation2 + $0x704] ss:$16 sps:$4 sm:$0xff]  }
  0x53   :  { %1832 = vmatprep.mubr.bf16.mxu1 %v4130_v24 }
  0x54   :  { %1762 = vmatpush1.bf16.msra.mxu0 %v3565_v25  ;;  %v3649_v25 = vld [vmem:[#allocation2 + $0x500] ss:$16 sps:$4 sm:$0xff]  }
  0x55   :  { %1803 = vmatpush1.bf16.msra.mxu1 %v3568_v26  ;;  %1763 = vmatprep.subr.bf16.mxu0 %v3573_v27  ;;  %v3652_v26 = vld [vmem:[#allocation2 + $0x700] ss:$16 sps:$4 sm:$0xff]   ;;  %v3658_v27 = vld [vmem:[#allocation2 + $0xec] ss:$16 sps:$4 sm:$0xff]  }
  0x56   :  { %1804 = vmatprep.subr.bf16.mxu1 %v3576_v28  ;;  %v3661_v28 = vld [vmem:[#allocation2 + $0x2ec] ss:$16 sps:$4 sm:$0xff]  }
  0x58   :  { %1764 = vmatpush1.bf16.msra.mxu0 %v3571_v29  ;;  %v4138_v29 = vcombine.high %v4112_v63, %v4112_v63 }
  0x59   :  { %1805 = vmatpush1.bf16.msra.mxu1 %v3574_v30  ;;  %1765 = vmatprep.subr.bf16.mxu0 %v3579_v31  ;;  %v3656_v30 = vld [vmem:[#allocation2 + $0xe8] ss:$16 sps:$4 sm:$0xff]  }
  0x5a   :  { %1806 = vmatprep.subr.bf16.mxu1 %v3582_v32  ;;  %v3659_v31 = vld [vmem:[#allocation2 + $0x2e8] ss:$16 sps:$4 sm:$0xff]   ;;  %v3664_v32 = vld [vmem:[#allocation2 + $0xcc] ss:$16 sps:$4 sm:$0xff]  }
  0x5c   :  { %1766 = vmatpush1.bf16.msra.mxu0 %v3577_v33  ;;  %v3667_v33 = vld [vmem:[#allocation2 + $0x2cc] ss:$16 sps:$4 sm:$0xff]  }
  0x5d   :  { %1807 = vmatpush1.bf16.msra.mxu1 %v3580_v34  ;;  %1767 = vmatprep.subr.bf16.mxu0 %v3585_v35  ;;  %v3662_v34 = vld [vmem:[#allocation2 + $0xc8] ss:$16 sps:$4 sm:$0xff]  }
  0x5e   :  { %1808 = vmatprep.subr.bf16.mxu1 %v3588_v36  ;;  %v3665_v35 = vld [vmem:[#allocation2 + $0x2c8] ss:$16 sps:$4 sm:$0xff]   ;;  %v3670_v36 = vld [vmem:[#allocation2 + $0xac] ss:$16 sps:$4 sm:$0xff]  }
  0x60   :  { %1768 = vmatpush1.bf16.msra.mxu0 %v3583_v37  ;;  %v3673_v37 = vld [vmem:[#allocation2 + $0x2ac] ss:$16 sps:$4 sm:$0xff]  }
  0x61   :  { %1809 = vmatpush1.bf16.msra.mxu1 %v3586_v38  ;;  %1769 = vmatprep.subr.bf16.mxu0 %v3591_v39  ;;  %v3668_v38 = vld [vmem:[#allocation2 + $0xa8] ss:$16 sps:$4 sm:$0xff]  }
  0x62   :  { %1810 = vmatprep.subr.bf16.mxu1 %v3594_v40  ;;  %v3671_v39 = vld [vmem:[#allocation2 + $0x2a8] ss:$16 sps:$4 sm:$0xff]   ;;  %v3676_v40 = vld [vmem:[#allocation2 + $0x8c] ss:$16 sps:$4 sm:$0xff]  }
  0x64   :  { %1770 = vmatpush1.bf16.msra.mxu0 %v3589_v41  ;;  %v3679_v41 = vld [vmem:[#allocation2 + $0x28c] ss:$16 sps:$4 sm:$0xff]  }
  0x65   :  { %1811 = vmatpush1.bf16.msra.mxu1 %v3592_v43  ;;  %1771 = vmatprep.subr.bf16.mxu0 %v3597_v44  ;;  %v3674_v43 = vld [vmem:[#allocation2 + $0x88] ss:$16 sps:$4 sm:$0xff]  }
  0x66   :  { %1812 = vmatprep.subr.bf16.mxu1 %v3600_v45  ;;  %v3677_v44 = vld [vmem:[#allocation2 + $0x288] ss:$16 sps:$4 sm:$0xff]   ;;  %v3682_v45 = vld [vmem:[#allocation2 + $0x6c] ss:$16 sps:$4 sm:$0xff]  }
  0x68   :  { %1772 = vmatpush1.bf16.msra.mxu0 %v3595_v46  ;;  %v3685_v46 = vld [vmem:[#allocation2 + $0x26c] ss:$16 sps:$4 sm:$0xff]  }
  0x69   :  { %1813 = vmatpush1.bf16.msra.mxu1 %v3598_v47  ;;  %1773 = vmatprep.subr.bf16.mxu0 %v3603_v48  ;;  %v3680_v47 = vld [vmem:[#allocation2 + $0x68] ss:$16 sps:$4 sm:$0xff]   ;;  %v3691_v48 = vld [vmem:[#allocation2 + $0x24c] ss:$16 sps:$4 sm:$0xff]  }
  0x6a   :  { %1814 = vmatprep.subr.bf16.mxu1 %v3606_v49  ;;  %v3686_v49 = vld [vmem:[#allocation2 + $0x48] ss:$16 sps:$4 sm:$0xff]  }
  0x6c   :  { %1774 = vmatpush1.bf16.msra.mxu0 %v3601_v50  ;;  %v3689_v50 = vld [vmem:[#allocation2 + $0x248] ss:$16 sps:$4 sm:$0xff]  }
  0x6d   :  { %1815 = vmatpush1.bf16.msra.mxu1 %v3604_v51  ;;  %1775 = vmatprep.subr.bf16.mxu0 %v3609_v52  ;;  %v3694_v51 = vld [vmem:[#allocation2 + $0x2c] ss:$16 sps:$4 sm:$0xff]  }
  0x6e   :  { %1816 = vmatprep.subr.bf16.mxu1 %v3612_v53  ;;  %v3697_v52 = vld [vmem:[#allocation2 + $0x22c] ss:$16 sps:$4 sm:$0xff]   ;;  %v3692_v53 = vld [vmem:[#allocation2 + $0x28] ss:$16 sps:$4 sm:$0xff]  }
  0x70   :  { %1776 = vmatpush2.bf16.msra.mxu0 %v3607_v54  ;;  %v3695_v54 = vld [vmem:[#allocation2 + $0x228] ss:$16 sps:$4 sm:$0xff]  }
  0x71   :  { %1817 = vmatpush2.bf16.msra.mxu1 %v3610_v55  ;;  %1777 = vmatprep.subr.bf16.mxu0 %v3615_v56  ;;  %v3700_v55 = vld [vmem:[#allocation2 + $0xc] ss:$16 sps:$4 sm:$0xff]  }
  0x72   :  { %1818 = vmatprep.subr.bf16.mxu1 %v3618_v57  ;;  %v3703_v56 = vld [vmem:[#allocation2 + $0x20c] ss:$16 sps:$4 sm:$0xff]   ;;  %v3698_v57 = vld [vmem:[#allocation2 + $0x8] ss:$16 sps:$4 sm:$0xff]  }
  0x74   :  { %1778 = vmatpush2.bf16.msra.mxu0 %v3613_v58  ;;  %v3701_v58 = vld [vmem:[#allocation2 + $0x208] ss:$16 sps:$4 sm:$0xff]  }
  0x75   :  { %1819 = vmatpush2.bf16.msra.mxu1 %v3616_v59  ;;  %1779 = vmatprep.subr.bf16.mxu0 %v3621_v60  ;;  %v3706_v59 = vld [vmem:[#allocation2 + $0x1ec] ss:$16 sps:$4 sm:$0xff]  }
  0x76   :  { %1820 = vmatprep.subr.bf16.mxu1 %v3624_v61  ;;  %v3709_v60 = vld [vmem:[#allocation2 + $0x3ec] ss:$16 sps:$4 sm:$0xff]   ;;  %v3704_v61 = vld [vmem:[#allocation2 + $0x1e8] ss:$16 sps:$4 sm:$0xff]  }
  0x78   :  { %1780 = vmatpush2.bf16.msra.mxu0 %v3619_v0  ;;  %v3707_v0 = vld [vmem:[#allocation2 + $0x3e8] ss:$16 sps:$4 sm:$0xff]  }
  0x79   :  { %1821 = vmatpush2.bf16.msra.mxu1 %v3622_v1  ;;  %1781 = vmatprep.subr.bf16.mxu0 %v3627_v2  ;;  %v3712_v1 = vld [vmem:[#allocation2 + $0x1cc] ss:$16 sps:$4 sm:$0xff]  }
  0x7a   :  { %1822 = vmatprep.subr.bf16.mxu1 %v3630_v4  ;;  %v3715_v2 = vld [vmem:[#allocation2 + $0x3cc] ss:$16 sps:$4 sm:$0xff]   ;;  %v3710_v4 = vld [vmem:[#allocation2 + $0x1c8] ss:$16 sps:$4 sm:$0xff]  }
  0x7c   :  { %1782 = vmatpush2.bf16.msra.mxu0 %v3625_v5  ;;  %v3713_v5 = vld [vmem:[#allocation2 + $0x3c8] ss:$16 sps:$4 sm:$0xff]  }
  0x7d   :  { %1823 = vmatpush2.bf16.msra.mxu1 %v3628_v6  ;;  %1783 = vmatprep.subr.bf16.mxu0 %v3633_v7  ;;  %v3718_v6 = vld [vmem:[#allocation2 + $0x1ac] ss:$16 sps:$4 sm:$0xff]  }
  0x7e   :  { %1824 = vmatprep.subr.bf16.mxu1 %v3636_v8  ;;  %v3721_v7 = vld [vmem:[#allocation2 + $0x3ac] ss:$16 sps:$4 sm:$0xff]   ;;  %v3716_v8 = vld [vmem:[#allocation2 + $0x1a8] ss:$16 sps:$4 sm:$0xff]  }
  0x80   :  { %1784 = vmatpush2.bf16.msra.mxu0 %v3631_v9  ;;  %v3719_v9 = vld [vmem:[#allocation2 + $0x3a8] ss:$16 sps:$4 sm:$0xff]  }
  0x81   :  { %1825 = vmatpush2.bf16.msra.mxu1 %v3634_v10  ;;  %1785 = vmatprep.subr.bf16.mxu0 %v3639_v11  ;;  %v3724_v10 = vld [vmem:[#allocation2 + $0x18c] ss:$16 sps:$4 sm:$0xff]  }
  0x82   :  { %1826 = vmatprep.subr.bf16.mxu1 %v3642_v12  ;;  %v3727_v11 = vld [vmem:[#allocation2 + $0x38c] ss:$16 sps:$4 sm:$0xff]   ;;  %v3722_v12 = vld [vmem:[#allocation2 + $0x188] ss:$16 sps:$4 sm:$0xff]  }
  0x84   :  { %1786 = vmatpush2.bf16.msra.mxu0 %v3637_v13  ;;  %v3725_v13 = vld [vmem:[#allocation2 + $0x388] ss:$16 sps:$4 sm:$0xff]  }
  0x85   :  { %1827 = vmatpush2.bf16.msra.mxu1 %v3640_v15  ;;  %1787 = vmatprep.subr.bf16.mxu0 %v3645_v16  ;;  %v3730_v15 = vld [vmem:[#allocation2 + $0x16c] ss:$16 sps:$4 sm:$0xff]  }
  0x86   :  { %1828 = vmatprep.subr.bf16.mxu1 %v3648_v17  ;;  %v3733_v16 = vld [vmem:[#allocation2 + $0x36c] ss:$16 sps:$4 sm:$0xff]   ;;  %v3728_v17 = vld [vmem:[#allocation2 + $0x168] ss:$16 sps:$4 sm:$0xff]  }
  0x88   :  { %1788 = vmatpush2.bf16.msra.mxu0 %v3643_v20  ;;  %v3731_v20 = vld [vmem:[#allocation2 + $0x368] ss:$16 sps:$4 sm:$0xff]  }
  0x89   :  { %1829 = vmatpush2.bf16.msra.mxu1 %v3646_v21  ;;  %1789 = vmatprep.subr.bf16.mxu0 %v3651_v22  ;;  %v3736_v21 = vld [vmem:[#allocation2 + $0x14c] ss:$16 sps:$4 sm:$0xff]  }
  0x8a   :  { %1830 = vmatprep.subr.bf16.mxu1 %v3654_v23  ;;  %v3739_v22 = vld [vmem:[#allocation2 + $0x34c] ss:$16 sps:$4 sm:$0xff]   ;;  %v3734_v23 = vld [vmem:[#allocation2 + $0x148] ss:$16 sps:$4 sm:$0xff]  }
  0x8c   :  { %1790 = vmatpush2.bf16.msra.mxu0 %v3649_v25  ;;  %v3737_v25 = vld [vmem:[#allocation2 + $0x348] ss:$16 sps:$4 sm:$0xff]  }
  0x8d   :  { %1831 = vmatpush2.bf16.msra.mxu1 %v3652_v26  ;;  %1841 = vmatprep.subr.bf16.mxu0 %v3658_v27  ;;  %v3742_v26 = vld [vmem:[#allocation2 + $0x12c] ss:$16 sps:$4 sm:$0xff]  }
  0x8e   :  { %1882 = vmatprep.subr.bf16.mxu1 %v3661_v28  ;;  %v3745_v27 = vld [vmem:[#allocation2 + $0x32c] ss:$16 sps:$4 sm:$0xff]   ;;  %v3740_v28 = vld [vmem:[#allocation2 + $0x128] ss:$16 sps:$4 sm:$0xff]  }
  0x8f   :  { %1792 = vmatmul.mubr.bf16.vlgmr.msra.gmra.mxu0 %v4112_v63 }
  0x90   :  { %1833 = vmatmul.mubr.bf16.vlgmr.msra.gmra.mxu1 %v4138_v29  ;;  %1842 = vmatpush1.bf16.msra.mxu0 %v3656_v30  ;;  %v3743_v30 = vld [vmem:[#allocation2 + $0x328] ss:$16 sps:$4 sm:$0xff]  }
  0x91   :  { %1883 = vmatpush1.bf16.msra.mxu1 %v3659_v31  ;;  %1843 = vmatprep.subr.bf16.mxu0 %v3664_v32  ;;  %v3748_v31 = vld [vmem:[#allocation2 + $0x10c] ss:$16 sps:$4 sm:$0xff]  }
  0x92   :  { %1884 = vmatprep.subr.bf16.mxu1 %v3667_v33  ;;  %1873 = vmatprep.mubr.bf16.mxu0 %v4110_v62  ;;  %v3683_v62 = vld [vmem:[#allocation2 + $0x268] ss:$16 sps:$4 sm:$0xff]   ;;  %v3751_v32 = vld [vmem:[#allocation2 + $0x30c] ss:$16 sps:$4 sm:$0xff]  }
  0x93   :  { %1914 = vmatprep.mubr.bf16.mxu1 %v4116_v3  ;;  %v3688_v3 = vld [vmem:[#allocation2 + $0x4c] ss:$16 sps:$4 sm:$0xff]   ;;  %v3746_v33 = vld [vmem:[#allocation2 + $0x108] ss:$16 sps:$4 sm:$0xff]  }
  0x94   :  { %1844 = vmatpush1.bf16.msra.mxu0 %v3662_v34  ;;  %v3749_v34 = vld [vmem:[#allocation2 + $0x308] ss:$16 sps:$4 sm:$0xff]  }
  0x95   :  { %1885 = vmatpush1.bf16.msra.mxu1 %v3665_v35  ;;  %1845 = vmatprep.subr.bf16.mxu0 %v3670_v36  ;;  %v3754_v35 = vld [vmem:[#allocation2 + $0x4ec] ss:$16 sps:$4 sm:$0xff]  }
  0x96   :  { %1886 = vmatprep.subr.bf16.mxu1 %v3673_v37  ;;  %v3757_v36 = vld [vmem:[#allocation2 + $0x6ec] ss:$16 sps:$4 sm:$0xff]   ;;  %v3752_v37 = vld [vmem:[#allocation2 + $0x4e8] ss:$16 sps:$4 sm:$0xff]  }
  0x98   :  { %1846 = vmatpush1.bf16.msra.mxu0 %v3668_v38  ;;  %v3755_v38 = vld [vmem:[#allocation2 + $0x6e8] ss:$16 sps:$4 sm:$0xff]  }
  0x99   :  { %1887 = vmatpush1.bf16.msra.mxu1 %v3671_v39  ;;  %1847 = vmatprep.subr.bf16.mxu0 %v3676_v40  ;;  %v3760_v39 = vld [vmem:[#allocation2 + $0x4cc] ss:$16 sps:$4 sm:$0xff]  }
  0x9a   :  { %1888 = vmatprep.subr.bf16.mxu1 %v3679_v41  ;;  %v3763_v40 = vld [vmem:[#allocation2 + $0x6cc] ss:$16 sps:$4 sm:$0xff]   ;;  %v3758_v41 = vld [vmem:[#allocation2 + $0x4c8] ss:$16 sps:$4 sm:$0xff]  }
  0x9c   :  { %1848 = vmatpush1.bf16.msra.mxu0 %v3674_v43  ;;  %v3761_v43 = vld [vmem:[#allocation2 + $0x6c8] ss:$16 sps:$4 sm:$0xff]  }
  0x9d   :  { %1889 = vmatpush1.bf16.msra.mxu1 %v3677_v44  ;;  %1849 = vmatprep.subr.bf16.mxu0 %v3682_v45  ;;  %v3766_v44 = vld [vmem:[#allocation2 + $0x4ac] ss:$16 sps:$4 sm:$0xff]  }
  0x9e   :  { %1890 = vmatprep.subr.bf16.mxu1 %v3685_v46  ;;  %v3769_v45 = vld [vmem:[#allocation2 + $0x6ac] ss:$16 sps:$4 sm:$0xff]   ;;  %v3764_v46 = vld [vmem:[#allocation2 + $0x4a8] ss:$16 sps:$4 sm:$0xff]  }
  0xa0   :  { %1850 = vmatpush1.bf16.msra.mxu0 %v3680_v47  ;;  %v3767_v47 = vld [vmem:[#allocation2 + $0x6a8] ss:$16 sps:$4 sm:$0xff]  }
  0xa1   :  { %1891 = vmatpush1.bf16.msra.mxu1 %v3683_v62  ;;  %1851 = vmatprep.subr.bf16.mxu0 %v3688_v3  ;;  %v3772_v62 = vld [vmem:[#allocation2 + $0x48c] ss:$16 sps:$4 sm:$0xff]   ;;  %v3770_v3 = vld [vmem:[#allocation2 + $0x488] ss:$16 sps:$4 sm:$0xff]  }
  0xa2   :  { %1892 = vmatprep.subr.bf16.mxu1 %v3691_v48  ;;  %v3778_v48 = vld [vmem:[#allocation2 + $0x46c] ss:$16 sps:$4 sm:$0xff]  }
  0xa4   :  { %1852 = vmatpush1.bf16.msra.mxu0 %v3686_v49  ;;  %v3781_v49 = vld [vmem:[#allocation2 + $0x66c] ss:$16 sps:$4 sm:$0xff]  }
  0xa5   :  { %1893 = vmatpush1.bf16.msra.mxu1 %v3689_v50  ;;  %1853 = vmatprep.subr.bf16.mxu0 %v3694_v51  ;;  %v3776_v50 = vld [vmem:[#allocation2 + $0x468] ss:$16 sps:$4 sm:$0xff]  }
  0xa6   :  { %1894 = vmatprep.subr.bf16.mxu1 %v3697_v52  ;;  %v3779_v51 = vld [vmem:[#allocation2 + $0x668] ss:$16 sps:$4 sm:$0xff]   ;;  %v3784_v52 = vld [vmem:[#allocation2 + $0x44c] ss:$16 sps:$4 sm:$0xff]  }
  0xa8   :  { %1854 = vmatpush1.bf16.msra.mxu0 %v3692_v53  ;;  %v3785_v53 = vld [vmem:[#allocation2 + $0x648] ss:$16 sps:$4 sm:$0xff]  }
  0xa9   :  { %1895 = vmatpush1.bf16.msra.mxu1 %v3695_v54  ;;  %1855 = vmatprep.subr.bf16.mxu0 %v3700_v55  ;;  %v3790_v54 = vld [vmem:[#allocation2 + $0x42c] ss:$16 sps:$4 sm:$0xff]  }
  0xaa   :  { %1896 = vmatprep.subr.bf16.mxu1 %v3703_v56  ;;  %v3793_v55 = vld [vmem:[#allocation2 + $0x62c] ss:$16 sps:$4 sm:$0xff]   ;;  %v3788_v56 = vld [vmem:[#allocation2 + $0x428] ss:$16 sps:$4 sm:$0xff]  }
  0xac   :  { %1856 = vmatpush1.bf16.msra.mxu0 %v3698_v57  ;;  %v3791_v57 = vld [vmem:[#allocation2 + $0x628] ss:$16 sps:$4 sm:$0xff]  }
  0xad   :  { %1897 = vmatpush1.bf16.msra.mxu1 %v3701_v58  ;;  %1857 = vmatprep.subr.bf16.mxu0 %v3706_v59  ;;  %v3796_v58 = vld [vmem:[#allocation2 + $0x40c] ss:$16 sps:$4 sm:$0xff]  }
  0xae   :  { %1898 = vmatprep.subr.bf16.mxu1 %v3709_v60  ;;  %v3799_v59 = vld [vmem:[#allocation2 + $0x60c] ss:$16 sps:$4 sm:$0xff]   ;;  %v3794_v60 = vld [vmem:[#allocation2 + $0x408] ss:$16 sps:$4 sm:$0xff]  }
  0xb0   :  { %1858 = vmatpush2.bf16.msra.mxu0 %v3704_v61  ;;  %v3797_v61 = vld [vmem:[#allocation2 + $0x608] ss:$16 sps:$4 sm:$0xff]  }
  0xb1   :  { %1899 = vmatpush2.bf16.msra.mxu1 %v3707_v0  ;;  %1859 = vmatprep.subr.bf16.mxu0 %v3712_v1  ;;  %v3802_v0 = vld [vmem:[#allocation2 + $0x5ec] ss:$16 sps:$4 sm:$0xff]  }
  0xb2   :  { %1900 = vmatprep.subr.bf16.mxu1 %v3715_v2  ;;  %v3805_v1 = vld [vmem:[#allocation2 + $0x7ec] ss:$16 sps:$4 sm:$0xff]   ;;  %v3800_v2 = vld [vmem:[#allocation2 + $0x5e8] ss:$16 sps:$4 sm:$0xff]  }
  0xb4   :  { %1860 = vmatpush2.bf16.msra.mxu0 %v3710_v4  ;;  %v3803_v4 = vld [vmem:[#allocation2 + $0x7e8] ss:$16 sps:$4 sm:$0xff]  }
  0xb5   :  { %1901 = vmatpush2.bf16.msra.mxu1 %v3713_v5  ;;  %1861 = vmatprep.subr.bf16.mxu0 %v3718_v6  ;;  %v3808_v5 = vld [vmem:[#allocation2 + $0x5cc] ss:$16 sps:$4 sm:$0xff]  }
  0xb6   :  { %1902 = vmatprep.subr.bf16.mxu1 %v3721_v7  ;;  %v3811_v6 = vld [vmem:[#allocation2 + $0x7cc] ss:$16 sps:$4 sm:$0xff]   ;;  %v3806_v7 = vld [vmem:[#allocation2 + $0x5c8] ss:$16 sps:$4 sm:$0xff]  }
  0xb8   :  { %1862 = vmatpush2.bf16.msra.mxu0 %v3716_v8  ;;  %v3809_v8 = vld [vmem:[#allocation2 + $0x7c8] ss:$16 sps:$4 sm:$0xff]  }
  0xb9   :  { %1903 = vmatpush2.bf16.msra.mxu1 %v3719_v9  ;;  %1863 = vmatprep.subr.bf16.mxu0 %v3724_v10  ;;  %v3814_v9 = vld [vmem:[#allocation2 + $0x5ac] ss:$16 sps:$4 sm:$0xff]  }
  0xba   :  { %1904 = vmatprep.subr.bf16.mxu1 %v3727_v11  ;;  %v3817_v10 = vld [vmem:[#allocation2 + $0x7ac] ss:$16 sps:$4 sm:$0xff]   ;;  %v3812_v11 = vld [vmem:[#allocation2 + $0x5a8] ss:$16 sps:$4 sm:$0xff]  }
  0xbc   :  { %1864 = vmatpush2.bf16.msra.mxu0 %v3722_v12  ;;  %v3815_v12 = vld [vmem:[#allocation2 + $0x7a8] ss:$16 sps:$4 sm:$0xff]  }
  0xbd   :  { %1905 = vmatpush2.bf16.msra.mxu1 %v3725_v13  ;;  %1865 = vmatprep.subr.bf16.mxu0 %v3730_v15  ;;  %v3820_v13 = vld [vmem:[#allocation2 + $0x58c] ss:$16 sps:$4 sm:$0xff]  }
  0xbe   :  { %1906 = vmatprep.subr.bf16.mxu1 %v3733_v16  ;;  %v3823_v15 = vld [vmem:[#allocation2 + $0x78c] ss:$16 sps:$4 sm:$0xff]   ;;  %v3818_v16 = vld [vmem:[#allocation2 + $0x588] ss:$16 sps:$4 sm:$0xff]  }
  0xc0   :  { %1866 = vmatpush2.bf16.msra.mxu0 %v3728_v17  ;;  %v3821_v17 = vld [vmem:[#allocation2 + $0x788] ss:$16 sps:$4 sm:$0xff]  }
  0xc1   :  { %1907 = vmatpush2.bf16.msra.mxu1 %v3731_v20  ;;  %1867 = vmatprep.subr.bf16.mxu0 %v3736_v21  ;;  %v3826_v20 = vld [vmem:[#allocation2 + $0x56c] ss:$16 sps:$4 sm:$0xff]  }
  0xc2   :  { %1908 = vmatprep.subr.bf16.mxu1 %v3739_v22  ;;  %v3829_v21 = vld [vmem:[#allocation2 + $0x76c] ss:$16 sps:$4 sm:$0xff]   ;;  %v3824_v22 = vld [vmem:[#allocation2 + $0x568] ss:$16 sps:$4 sm:$0xff]  }
  0xc4   :  { %1868 = vmatpush2.bf16.msra.mxu0 %v3734_v23  ;;  %v3827_v23 = vld [vmem:[#allocation2 + $0x768] ss:$16 sps:$4 sm:$0xff]  }
  0xc5   :  { %1909 = vmatpush2.bf16.msra.mxu1 %v3737_v25  ;;  %1869 = vmatprep.subr.bf16.mxu0 %v3742_v26  ;;  %v3832_v25 = vld [vmem:[#allocation2 + $0x54c] ss:$16 sps:$4 sm:$0xff]  }
  0xc6   :  { %1910 = vmatprep.subr.bf16.mxu1 %v3745_v27  ;;  %v3835_v26 = vld [vmem:[#allocation2 + $0x74c] ss:$16 sps:$4 sm:$0xff]   ;;  %v3830_v27 = vld [vmem:[#allocation2 + $0x548] ss:$16 sps:$4 sm:$0xff]  }
  0xc8   :  { %1870 = vmatpush2.bf16.msra.mxu0 %v3740_v28  ;;  %v3833_v28 = vld [vmem:[#allocation2 + $0x748] ss:$16 sps:$4 sm:$0xff]  }
  0xc9   :  { %1911 = vmatpush2.bf16.msra.mxu1 %v3743_v30  ;;  %1871 = vmatprep.subr.bf16.mxu0 %v3748_v31  ;;  %v3838_v30 = vld [vmem:[#allocation2 + $0x52c] ss:$16 sps:$4 sm:$0xff]  }
  0xca   :  { %1912 = vmatprep.subr.bf16.mxu1 %v3751_v32  ;;  %v3841_v31 = vld [vmem:[#allocation2 + $0x72c] ss:$16 sps:$4 sm:$0xff]   ;;  %v3836_v32 = vld [vmem:[#allocation2 + $0x528] ss:$16 sps:$4 sm:$0xff]  }
  0xcc   :  { %1872 = vmatpush2.bf16.msra.mxu0 %v3746_v33  ;;  %v3839_v33 = vld [vmem:[#allocation2 + $0x728] ss:$16 sps:$4 sm:$0xff]  }
  0xcd   :  { %1913 = vmatpush2.bf16.msra.mxu1 %v3749_v34  ;;  %1923 = vmatprep.subr.bf16.mxu0 %v3754_v35  ;;  %v3844_v34 = vld [vmem:[#allocation2 + $0x50c] ss:$16 sps:$4 sm:$0xff]  }
  0xce   :  { %1964 = vmatprep.subr.bf16.mxu1 %v3757_v36  ;;  %v3847_v35 = vld [vmem:[#allocation2 + $0x70c] ss:$16 sps:$4 sm:$0xff]   ;;  %v3842_v36 = vld [vmem:[#allocation2 + $0x508] ss:$16 sps:$4 sm:$0xff]  }
  0xcf   :  { %1874 = vmatmul.mubr.bf16.vlgmr.msra.gmra.mxu0 %v4120_v14  ;;  %v3775_v14 = vld [vmem:[#allocation2 + $0x68c] ss:$16 sps:$4 sm:$0xff]  }
  0xd0   :  { %1915 = vmatmul.mubr.bf16.vlgmr.msra.gmra.mxu1 %v4126_v19  ;;  %1924 = vmatpush1.bf16.msra.mxu0 %v3752_v37  ;;  %v3773_v19 = vld [vmem:[#allocation2 + $0x688] ss:$16 sps:$4 sm:$0xff]  }
  0xd1   :  { %1965 = vmatpush1.bf16.msra.mxu1 %v3755_v38  ;;  %1925 = vmatprep.subr.bf16.mxu0 %v3760_v39  ;;  %v3845_v37 = vld [vmem:[#allocation2 + $0x708] ss:$16 sps:$4 sm:$0xff]   ;;  %v3850_v38 = vld [vmem:[%s4530_s3 + $0x74] ss:$8 sps:$4 sm:$0xff]  }
  0xd2   :  { %1966 = vmatprep.subr.bf16.mxu1 %v3763_v40  ;;  %1955 = vmatprep.mubr.bf16.mxu0 %v4122_v18  ;;  %v3787_v18 = vld [vmem:[#allocation2 + $0x64c] ss:$16 sps:$4 sm:$0xff]   ;;  %v3848_v39 = vld [vmem:[%s4530_s3 + $0x70] ss:$8 sps:$4 sm:$0xff]  }
  0xd3   :  { %1996 = vmatprep.mubr.bf16.mxu1 %v4130_v24  ;;  %v3782_v24 = vld [vmem:[#allocation2 + $0x448] ss:$16 sps:$4 sm:$0xff]   ;;  %v3853_v40 = vld [vmem:[%s4530_s3 + $0x64] ss:$8 sps:$4 sm:$0xff]  }
  0xd4   :  { %1926 = vmatpush1.bf16.msra.mxu0 %v3758_v41 }
  0xd5   :  { %1967 = vmatpush1.bf16.msra.mxu1 %v3761_v43  ;;  %1927 = vmatprep.subr.bf16.mxu0 %v3766_v44  ;;  %v3851_v44 = vld [vmem:[%s4530_s3 + $0x60] ss:$8 sps:$4 sm:$0xff]  }
  0xd6   :  { %1968 = vmatprep.subr.bf16.mxu1 %v3769_v45 }
  0xd8   :  { %1928 = vmatpush1.bf16.msra.mxu0 %v3764_v46 }
  0xd9   :  { %1969 = vmatpush1.bf16.msra.mxu1 %v3767_v47  ;;  %1929 = vmatprep.subr.bf16.mxu0 %v3772_v62  ;;  %v3856_v47 = vld [vmem:[%s4530_s3 + $0x54] ss:$8 sps:$4 sm:$0xff]  }
  0xda   :  { %1970 = vmatprep.subr.bf16.mxu1 %v3775_v14 }
  0xdc   :  { %1930 = vmatpush1.bf16.msra.mxu0 %v3770_v3 }
  0xdd   :  { %1971 = vmatpush1.bf16.msra.mxu1 %v3773_v19  ;;  %1931 = vmatprep.subr.bf16.mxu0 %v3778_v48  ;;  %v3859_v19 = vld [vmem:[%s4530_s3 + $0x44] ss:$8 sps:$4 sm:$0xff]   ;;  %v3896_v48 = vld [vmem:[%s4530_s3 + $0x170] ss:$8 sps:$4 sm:$0xff]  }
  0xde   :  { %1972 = vmatprep.subr.bf16.mxu1 %v3781_v49  ;;  %v3898_v49 = vld [vmem:[%s4530_s3 + $0x174] ss:$8 sps:$4 sm:$0xff]  }
  0xe0   :  { %1932 = vmatpush1.bf16.msra.mxu0 %v3776_v50  ;;  %v3901_v50 = vld [vmem:[%s4530_s3 + $0x164] ss:$8 sps:$4 sm:$0xff]  }
  0xe1   :  { %1973 = vmatpush1.bf16.msra.mxu1 %v3779_v51  ;;  %1933 = vmatprep.subr.bf16.mxu0 %v3784_v52  ;;  %v3857_v51 = vld [vmem:[%s4530_s3 + $0x40] ss:$8 sps:$4 sm:$0xff]  }
  0xe2   :  { %1974 = vmatprep.subr.bf16.mxu1 %v3787_v18  ;;  %v3899_v52 = vld [vmem:[%s4530_s3 + $0x160] ss:$8 sps:$4 sm:$0xff]   ;;  %v3862_v18 = vld [vmem:[%s4530_s3 + $0x34] ss:$8 sps:$4 sm:$0xff]  }
  0xe4   :  { %1934 = vmatpush1.bf16.msra.mxu0 %v3782_v24  ;;  %v3904_v24 = vld [vmem:[%s4530_s3 + $0x154] ss:$8 sps:$4 sm:$0xff]  }
  0xe5   :  { %1975 = vmatpush1.bf16.msra.mxu1 %v3785_v53  ;;  %1935 = vmatprep.subr.bf16.mxu0 %v3790_v54  ;;  %v3860_v53 = vld [vmem:[%s4530_s3 + $0x30] ss:$8 sps:$4 sm:$0xff]  }
  0xe6   :  { %1976 = vmatprep.subr.bf16.mxu1 %v3793_v55  ;;  %v3902_v54 = vld [vmem:[%s4530_s3 + $0x150] ss:$8 sps:$4 sm:$0xff]   ;;  %v3865_v55 = vld [vmem:[%s4530_s3 + $0x24] ss:$8 sps:$4 sm:$0xff]  }
  0xe8   :  { %1936 = vmatpush1.bf16.msra.mxu0 %v3788_v56  ;;  %v3907_v56 = vld [vmem:[%s4530_s3 + $0x144] ss:$8 sps:$4 sm:$0xff]  }
  0xe9   :  { %1977 = vmatpush1.bf16.msra.mxu1 %v3791_v57  ;;  %1937 = vmatprep.subr.bf16.mxu0 %v3796_v58  ;;  %v3863_v57 = vld [vmem:[%s4530_s3 + $0x20] ss:$8 sps:$4 sm:$0xff]  }
  0xea   :  { %1978 = vmatprep.subr.bf16.mxu1 %v3799_v59  ;;  %v3905_v58 = vld [vmem:[%s4530_s3 + $0x140] ss:$8 sps:$4 sm:$0xff]   ;;  %v3868_v59 = vld [vmem:[%s4530_s3 + $0x14] ss:$8 sps:$4 sm:$0xff]  }
  0xec   :  { %1938 = vmatpush1.bf16.msra.mxu0 %v3794_v60  ;;  %v3910_v60 = vld [vmem:[%s4530_s3 + $0x134] ss:$8 sps:$4 sm:$0xff]  }
  0xed   :  { %1979 = vmatpush1.bf16.msra.mxu1 %v3797_v61  ;;  %1939 = vmatprep.subr.bf16.mxu0 %v3802_v0  ;;  %v3866_v61 = vld [vmem:[%s4530_s3 + $0x10] ss:$8 sps:$4 sm:$0xff]  }
  0xee   :  { %1980 = vmatprep.subr.bf16.mxu1 %v3805_v1  ;;  %v3908_v0 = vld [vmem:[%s4530_s3 + $0x130] ss:$8 sps:$4 sm:$0xff]   ;;  %v3871_v1 = vld [vmem:[%s4530_s3 + $0x4] ss:$8 sps:$4 sm:$0xff]  }
  0xf0   :  { %1940 = vmatpush2.bf16.msra.mxu0 %v3800_v2  ;;  %v3913_v2 = vld [vmem:[%s4530_s3 + $0x124] ss:$8 sps:$4 sm:$0xff]  }
  0xf1   :  { %1981 = vmatpush2.bf16.msra.mxu1 %v3803_v4  ;;  %1941 = vmatprep.subr.bf16.mxu0 %v3808_v5  ;;  %v3869_v4 = vld [vmem:[%s4530_s3] ss:$8 sps:$4 sm:$0xff]  }
  0xf2   :  { %1982 = vmatprep.subr.bf16.mxu1 %v3811_v6  ;;  %v3911_v5 = vld [vmem:[%s4530_s3 + $0x120] ss:$8 sps:$4 sm:$0xff]   ;;  %v3874_v6 = vld [vmem:[%s4530_s3 + $0xf4] ss:$8 sps:$4 sm:$0xff]  }
  0xf4   :  { %1942 = vmatpush2.bf16.msra.mxu0 %v3806_v7  ;;  %v3916_v7 = vld [vmem:[%s4530_s3 + $0x114] ss:$8 sps:$4 sm:$0xff]  }
  0xf5   :  { %1983 = vmatpush2.bf16.msra.mxu1 %v3809_v8  ;;  %1943 = vmatprep.subr.bf16.mxu0 %v3814_v9  ;;  %v3872_v8 = vld [vmem:[%s4530_s3 + $0xf0] ss:$8 sps:$4 sm:$0xff]  }
  0xf6   :  { %1984 = vmatprep.subr.bf16.mxu1 %v3817_v10  ;;  %v3914_v9 = vld [vmem:[%s4530_s3 + $0x110] ss:$8 sps:$4 sm:$0xff]   ;;  %v3877_v10 = vld [vmem:[%s4530_s3 + $0xe4] ss:$8 sps:$4 sm:$0xff]  }
  0xf8   :  { %1944 = vmatpush2.bf16.msra.mxu0 %v3812_v11  ;;  %v3919_v11 = vld [vmem:[%s4530_s3 + $0x104] ss:$8 sps:$4 sm:$0xff]  }
  0xf9   :  { %1985 = vmatpush2.bf16.msra.mxu1 %v3815_v12  ;;  %1945 = vmatprep.subr.bf16.mxu0 %v3820_v13  ;;  %v3875_v12 = vld [vmem:[%s4530_s3 + $0xe0] ss:$8 sps:$4 sm:$0xff]  }
  0xfa   :  { %1986 = vmatprep.subr.bf16.mxu1 %v3823_v15  ;;  %v3917_v13 = vld [vmem:[%s4530_s3 + $0x100] ss:$8 sps:$4 sm:$0xff]   ;;  %v3880_v15 = vld [vmem:[%s4530_s3 + $0xd4] ss:$8 sps:$4 sm:$0xff]  }
  0xfc   :  { %1946 = vmatpush2.bf16.msra.mxu0 %v3818_v16  ;;  %v3922_v16 = vld [vmem:[%s4530_s3 + $0x1f4] ss:$8 sps:$4 sm:$0xff]  }
  0xfd   :  { %1987 = vmatpush2.bf16.msra.mxu1 %v3821_v17  ;;  %1947 = vmatprep.subr.bf16.mxu0 %v3826_v20  ;;  %v3878_v17 = vld [vmem:[%s4530_s3 + $0xd0] ss:$8 sps:$4 sm:$0xff]  }
  0xfe   :  { %1988 = vmatprep.subr.bf16.mxu1 %v3829_v21  ;;  %v3920_v20 = vld [vmem:[%s4530_s3 + $0x1f0] ss:$8 sps:$4 sm:$0xff]   ;;  %v3883_v21 = vld [vmem:[%s4530_s3 + $0xc4] ss:$8 sps:$4 sm:$0xff]  }
 0x100   :  { %1948 = vmatpush2.bf16.msra.mxu0 %v3824_v22  ;;  %v3925_v22 = vld [vmem:[%s4530_s3 + $0x1e4] ss:$8 sps:$4 sm:$0xff]  }
 0x101   :  { %1989 = vmatpush2.bf16.msra.mxu1 %v3827_v23  ;;  %1949 = vmatprep.subr.bf16.mxu0 %v3832_v25  ;;  %v3881_v23 = vld [vmem:[%s4530_s3 + $0xc0] ss:$8 sps:$4 sm:$0xff]  }
 0x102   :  { %1990 = vmatprep.subr.bf16.mxu1 %v3835_v26  ;;  %v3923_v25 = vld [vmem:[%s4530_s3 + $0x1e0] ss:$8 sps:$4 sm:$0xff]   ;;  %v3886_v26 = vld [vmem:[%s4530_s3 + $0xb4] ss:$8 sps:$4 sm:$0xff]  }
 0x104   :  { %1950 = vmatpush2.bf16.msra.mxu0 %v3830_v27  ;;  %v3928_v27 = vld [vmem:[%s4530_s3 + $0x1d4] ss:$8 sps:$4 sm:$0xff]  }
 0x105   :  { %1991 = vmatpush2.bf16.msra.mxu1 %v3833_v28  ;;  %1951 = vmatprep.subr.bf16.mxu0 %v3838_v30  ;;  %v3884_v28 = vld [vmem:[%s4530_s3 + $0xb0] ss:$8 sps:$4 sm:$0xff]  }
 0x106   :  { %1992 = vmatprep.subr.bf16.mxu1 %v3841_v31  ;;  %v3926_v30 = vld [vmem:[%s4530_s3 + $0x1d0] ss:$8 sps:$4 sm:$0xff]   ;;  %v3889_v31 = vld [vmem:[%s4530_s3 + $0xa4] ss:$8 sps:$4 sm:$0xff]  }
 0x108   :  { %1952 = vmatpush2.bf16.msra.mxu0 %v3836_v32  ;;  %v3931_v32 = vld [vmem:[%s4530_s3 + $0x1c4] ss:$8 sps:$4 sm:$0xff]  }
 0x109   :  { %1993 = vmatpush2.bf16.msra.mxu1 %v3839_v33  ;;  %1953 = vmatprep.subr.bf16.mxu0 %v3844_v34  ;;  %v3887_v33 = vld [vmem:[%s4530_s3 + $0xa0] ss:$8 sps:$4 sm:$0xff]  }
 0x10a   :  { %1994 = vmatprep.subr.bf16.mxu1 %v3847_v35  ;;  %v3929_v34 = vld [vmem:[%s4530_s3 + $0x1c0] ss:$8 sps:$4 sm:$0xff]   ;;  %v3892_v35 = vld [vmem:[%s4530_s3 + $0x94] ss:$8 sps:$4 sm:$0xff]  }
 0x10c   :  { %1954 = vmatpush2.bf16.msra.mxu0 %v3842_v36  ;;  %v3934_v36 = vld [vmem:[%s4530_s3 + $0x1b4] ss:$8 sps:$4 sm:$0xff]  }
 0x10d   :  { %1995 = vmatpush2.bf16.msra.mxu1 %v3845_v37  ;;  %2409 = vmatprep.subr.bf16.mxu0 %v3850_v38  ;;  %v321_v37 = vsub.s32 0, %v4104_v42  ;;  %v4324_v38 = vld [vmem:[%s4529_s2] sm:$0xf] }
 0x10e   :  { %2450 = vmatprep.subr.bf16.mxu1 %v3898_v49  ;;  %v3935_v49 = vld [vmem:[%s4530_s3 + $0x1a0] ss:$8 sps:$4 sm:$0xff]  }
 0x10f   :  { %v4157_v41 = vpop.f32.mrf.mxu0  ;;  %1956 = vmatmul.mubr.bf16.vlgmr.msra.gmra.mxu0 %v4112_v63  ;;  %v3854_v63 = vld [vmem:[%s4530_s3 + $0x50] ss:$8 sps:$4 sm:$0xff]  }
 0x110   :  { %v4159_v43 = vpop.f32.mrf.mxu1  ;;  %1997 = vmatmul.mubr.bf16.vlgmr.msra.gmra.mxu1 %v4138_v29  ;;  %2410 = vmatpush1.bf16.msra.mxu0 %v3848_v39  ;;  %v325_v39 = vsub.s32 1, %v4104_v42 }
 0x111   :  { %v4166_v45 = vpop.f32.mrf.mxu0  ;;  %2411 = vmatprep.subr.bf16.mxu0 %v3853_v40  ;;  %2451 = vmatpush1.bf16.msra.mxu1 %v3896_v48  ;;  %v3890_v40 = vld [vmem:[%s4530_s3 + $0x90] ss:$8 sps:$4 sm:$0xff]  }
 0x112   :  { %v4168_v46 = vpop.f32.mrf.mxu1  ;;  %2452 = vmatprep.subr.bf16.mxu1 %v3901_v50 }
 0x113   :  { %v1715_v62 = vpop.f32.mrf.mxu0 }
 0x114   :  { %v1756_v14 = vpop.f32.mrf.mxu1  ;;  %2412 = vmatpush1.bf16.msra.mxu0 %v3851_v44  ;;  %v3932_v44 = vld [vmem:[%s4530_s3 + $0x1b0] ss:$8 sps:$4 sm:$0xff]   ;;  %v322_v62 = vrot.slane %v4324_v38, %v321_v37 }
 0x115   :  { %v1716_v29 = vpop.f32.mrf.mxu0  ;;  %2413 = vmatprep.subr.bf16.mxu0 %v3856_v47  ;;  %2453 = vmatpush1.bf16.msra.mxu1 %v3899_v52  ;;  %v3895_v47 = vld [vmem:[%s4530_s3 + $0x84] ss:$8 sps:$4 sm:$0xff]   ;;  %v326_v14 = vrot.slane %v4324_v38, %v325_v39 }
 0x116   :  { %v1757_v3 = vpop.f32.mrf.mxu1  ;;  %2454 = vmatprep.subr.bf16.mxu1 %v3904_v24  ;;  %v1712_v29 = vadd.f32 %v4157_v41, %v322_v62  ;;  %v3940_v24 = vld [vmem:[%s4530_s3 + $0x194] ss:$8 sps:$4 sm:$0xff]  }
 0x117   :  { %v1714_v3 = vadd.f32 %v4166_v45, %v326_v14 }
 0x118   :  { %2414 = vmatpush1.bf16.msra.mxu0 %v3854_v63  ;;  %v3893_v63 = vld [vmem:[%s4530_s3 + $0x80] ss:$8 sps:$4 sm:$0xff]   ;;  %v1753_v48 = vadd.f32 %v4159_v43, %v1712_v29  ;;  %v3938_v43 = vld [vmem:[%s4530_s3 + $0x190] ss:$8 sps:$4 sm:$0xff]  }
 0x119   :  { %2415 = vmatprep.subr.bf16.mxu0 %v3859_v19  ;;  %2455 = vmatpush1.bf16.msra.mxu1 %v3902_v54  ;;  %v3937_v19 = vld [vmem:[%s4530_s3 + $0x1a4] ss:$8 sps:$4 sm:$0xff]   ;;  %v1755_v52 = vadd.f32 %v4168_v46, %v1714_v3 }
 0x11a   :  { %2456 = vmatprep.subr.bf16.mxu1 %v3907_v56 }
 0x11c   :  { %2416 = vmatpush1.bf16.msra.mxu0 %v3857_v51 }
 0x11d   :  { %2417 = vmatprep.subr.bf16.mxu0 %v3862_v18  ;;  %2457 = vmatpush1.bf16.msra.mxu1 %v3905_v58 }
 0x11e   :  { %2458 = vmatprep.subr.bf16.mxu1 %v3910_v60  ;;  %v3943_v60 = vld [vmem:[%s4530_s3 + $0x184] ss:$8 sps:$4 sm:$0xff]  }
 0x120   :  { %2418 = vmatpush1.bf16.msra.mxu0 %v3860_v53 }
 0x121   :  { %2419 = vmatprep.subr.bf16.mxu0 %v3865_v55  ;;  %2459 = vmatpush1.bf16.msra.mxu1 %v3908_v0  ;;  %v3941_v0 = vld [vmem:[%s4530_s3 + $0x180] ss:$8 sps:$4 sm:$0xff]  }
 0x122   :  { %2460 = vmatprep.subr.bf16.mxu1 %v3913_v2 }
 0x124   :  { %2420 = vmatpush1.bf16.msra.mxu0 %v3863_v57 }
 0x125   :  { %2421 = vmatprep.subr.bf16.mxu0 %v3868_v59  ;;  %2461 = vmatpush1.bf16.msra.mxu1 %v3911_v5 }
 0x126   :  { %2462 = vmatprep.subr.bf16.mxu1 %v3916_v7 }
 0x128   :  { %2422 = vmatpush1.bf16.msra.mxu0 %v3866_v61 }
 0x129   :  { %2423 = vmatprep.subr.bf16.mxu0 %v3871_v1  ;;  %2463 = vmatpush1.bf16.msra.mxu1 %v3914_v9 }
 0x12a   :  { %2464 = vmatprep.subr.bf16.mxu1 %v3919_v11 }
 0x12c   :  { %2424 = vmatpush1.bf16.msra.mxu0 %v3869_v4 }
 0x12d   :  { %2425 = vmatprep.subr.bf16.mxu0 %v3874_v6  ;;  %2465 = vmatpush1.bf16.msra.mxu1 %v3917_v13  ;;  %v3945_v13 = vld [vmem:[%s4532_s5 + $0x38] sm:$0xff]  }
 0x12e   :  { %2466 = vmatprep.subr.bf16.mxu1 %v3922_v16  ;;  %v3947_v16 = vld [vmem:[%s4532_s5 + $0x30] sm:$0xff]  }
 0x130   :  { %2426 = vmatpush2.bf16.msra.mxu0 %v3872_v8 }
 0x131   :  { %2427 = vmatprep.subr.bf16.mxu0 %v3877_v10  ;;  %2467 = vmatpush2.bf16.msra.mxu1 %v3920_v20  ;;  %v3949_v20 = vld [vmem:[%s4532_s5 + $0x28] sm:$0xff]  }
 0x132   :  { %2468 = vmatprep.subr.bf16.mxu1 %v3925_v22  ;;  %v3951_v22 = vld [vmem:[%s4532_s5 + $0x20] sm:$0xff]  }
 0x134   :  { %2428 = vmatpush2.bf16.msra.mxu0 %v3875_v12  ;;  %v3944_v12 = vld [vmem:[%s4532_s5 + $0x78] sm:$0xff]  }
 0x135   :  { %2429 = vmatprep.subr.bf16.mxu0 %v3880_v15  ;;  %2469 = vmatpush2.bf16.msra.mxu1 %v3923_v25  ;;  %v3946_v15 = vld [vmem:[%s4532_s5 + $0x70] sm:$0xff]   ;;  %v3953_v25 = vld [vmem:[%s4532_s5 + $0x18] sm:$0xff]  }
 0x136   :  { %2470 = vmatprep.subr.bf16.mxu1 %v3928_v27  ;;  %v3955_v27 = vld [vmem:[%s4532_s5 + $0x10] sm:$0xff]  }
 0x138   :  { %2430 = vmatpush2.bf16.msra.mxu0 %v3878_v17  ;;  %v3948_v17 = vld [vmem:[%s4532_s5 + $0x68] sm:$0xff]  }
 0x139   :  { %2431 = vmatprep.subr.bf16.mxu0 %v3883_v21  ;;  %2471 = vmatpush2.bf16.msra.mxu1 %v3926_v30  ;;  %v3950_v21 = vld [vmem:[%s4532_s5 + $0x60] sm:$0xff]   ;;  %v333_v30 = vsub.s32 3, %v4104_v42 }
 0x13a   :  { %2472 = vmatprep.subr.bf16.mxu1 %v3931_v32 }
 0x13b   :  { %v334_v32 = vrot.slane %v4324_v38, %v333_v30 }
 0x13c   :  { %2432 = vmatpush2.bf16.msra.mxu0 %v3881_v23  ;;  %v3952_v23 = vld [vmem:[%s4532_s5 + $0x58] sm:$0xff]  }
 0x13d   :  { %2433 = vmatprep.subr.bf16.mxu0 %v3886_v26  ;;  %2473 = vmatpush2.bf16.msra.mxu1 %v3929_v34  ;;  %v3954_v26 = vld [vmem:[%s4532_s5 + $0x50] sm:$0xff]  }
 0x13e   :  { %2474 = vmatprep.subr.bf16.mxu1 %v3934_v36 }
 0x140   :  { %2434 = vmatpush2.bf16.msra.mxu0 %v3884_v28  ;;  %v329_v28 = vsub.s32 2, %v4104_v42  ;;  %v3966_v42 = vld [vmem:[%s4534_s7 + $0x8] sm:$0xff]  }
 0x141   :  { %2435 = vmatprep.subr.bf16.mxu0 %v3889_v31  ;;  %2475 = vmatpush2.bf16.msra.mxu1 %v3932_v44 }
 0x142   :  { %2476 = vmatprep.subr.bf16.mxu1 %v3937_v19  ;;  %v330_v31 = vrot.slane %v4324_v38, %v329_v28 }
 0x144   :  { %2436 = vmatpush2.bf16.msra.mxu0 %v3887_v33 }
 0x145   :  { %2437 = vmatprep.subr.bf16.mxu0 %v3892_v35  ;;  %2477 = vmatpush2.bf16.msra.mxu1 %v3935_v49 }
 0x146   :  { %2478 = vmatprep.subr.bf16.mxu1 %v3940_v24  ;;  %v3957_v24 = vld [vmem:[%s4532_s5 + $0x8] sm:$0xff]  }
 0x148   :  { %2438 = vmatpush2.bf16.msra.mxu0 %v3890_v40 }
 0x149   :  { %2439 = vmatprep.subr.bf16.mxu0 %v3895_v47  ;;  %2479 = vmatpush2.bf16.msra.mxu1 %v3938_v43  ;;  %v3958_v43 = vld [vmem:[%s4532_s5 + $0x40] sm:$0xff]  }
 0x14a   :  { %2480 = vmatprep.subr.bf16.mxu1 %v3943_v60  ;;  %v3963_v60 = vld [vmem:[%s4534_s7 + $0x20] sm:$0xff]  }
 0x14c   :  { %2440 = vmatpush2.bf16.msra.mxu0 %v3893_v63 }
 0x14d   :  { %2481 = vmatpush2.bf16.msra.mxu1 %v3941_v0  ;;  %3359 = vmatprep.subr.bf16.mxu0 %v3944_v12  ;;  %v2077_v0 = vld [vmem:[%s4531_s4] sm:$0x3] }
 0x14f   :  { %v1793_v50 = vpop.f32.mrf.mxu0 }
 0x150   :  { %v1834_v51 = vpop.f32.mrf.mxu1  ;;  %v1794_v18 = vadd.f32 %v1793_v50, %v1753_v48 }
 0x151   :  { %v1795_v41 = vpop.f32.mrf.mxu0 }
 0x152   :  { %v1836_v45 = vpop.f32.mrf.mxu1  ;;  %v1835_v53 = vadd.f32 %v1834_v51, %v1794_v18  ;;  %v1796_v54 = vadd.f32 %v1795_v41, %v1755_v52 }
 0x153   :  { %v1797_v55 = vpop.f32.mrf.mxu0 }
 0x154   :  { %v1838_v56 = vpop.f32.mrf.mxu1  ;;  %v1837_v57 = vadd.f32 %v1836_v45, %v1796_v54  ;;  %v2005_v46 = vmax.f32 %v1835_v53, 0.0  ;;  %v3956_v45 = vld [vmem:[%s4532_s5 + $0x48] sm:$0xff]   ;;  %v3959_v55 = vld [vmem:[%s4532_s5] sm:$0xff]  }
 0x155   :  { %v1798_v58 = vpop.f32.mrf.mxu0 }
 0x156   :  { %v1839_v59 = vpop.f32.mrf.mxu1  ;;  %v2006_v61 = vmax.f32 %v1837_v57, 0.0  ;;  %v2009_v2 = vpack.c.bf16 %v2005_v46, %v2005_v46  ;;  %v3960_v57 = vld [vmem:[%s4534_s7 + $0x38] sm:$0xff]   ;;  %v4028_v46 = vmov 0.0   ;;  %v3961_v58 = vld [vmem:[%s4534_s7 + $0x30] sm:$0xff]  }
 0x157   :  { %3404 = vmatprep.subr.bf16.mxu1 %v4028_v46  ;;  %v3962_v59 = vld [vmem:[%s4534_s7 + $0x28] sm:$0xff]  }
 0x158   :  { %v2010_v1 = vpack.c.bf16 %v2006_v61, %v2006_v61  ;;  %v3964_v61 = vld [vmem:[%s4534_s7 + $0x18] sm:$0xff]  }
 0x15a   :  { %2441 = vmatprep.mubr.bf16.mxu0 %v2010_v1  ;;  %v2082_v1 = vrot.slane %v2077_v0, %v321_v37  ;;  %v3965_v37 = vld [vmem:[%s4534_s7 + $0x10] sm:$0xff]  }
 0x15b   :  { %2442 = vmatmul.mubr.bf16.vlgmr.msra.gmra.mxu0 %v2009_v2  ;;  %v2086_v2 = vrot.slane %v2077_v0, %v325_v39  ;;  %v3967_v39 = vld [vmem:[%s4534_s7] sm:$0xff]  }
 0x15c   :  { %3360 = vmatpush3.bf16.msra.mxu0 %v3945_v13 }
 0x15d   :  { %3361 = vmatprep.subr.bf16.mxu0 %v3946_v15 }
 0x160   :  { %3362 = vmatpush3.bf16.msra.mxu0 %v3947_v16 }
 0x161   :  { %3363 = vmatprep.subr.bf16.mxu0 %v3948_v17  ;;  %v3968_v17 = vld [vmem:[%s4536_s9 + $0x18] sm:$0xff]  }
 0x164   :  { %3364 = vmatpush3.bf16.msra.mxu0 %v3949_v20  ;;  %v3969_v20 = vld [vmem:[%s4536_s9 + $0x10] sm:$0xff]  }
 0x165   :  { %3365 = vmatprep.subr.bf16.mxu0 %v3950_v21 }
 0x168   :  { %3366 = vmatpush3.bf16.msra.mxu0 %v3951_v22  ;;  %v3318_v22 = vld [vmem:[%s4533_s6] ss:$0 sm:$0xff] }
 0x169   :  { %3367 = vmatprep.subr.bf16.mxu0 %v3952_v23 }
 0x16c   :  { %3368 = vmatpush3.bf16.msra.mxu0 %v3953_v25 }
 0x16d   :  { %3369 = vmatprep.subr.bf16.mxu0 %v3954_v26 }
 0x170   :  { %3370 = vmatpush3.bf16.msra.mxu0 %v3955_v27 }
 0x171   :  { %3371 = vmatprep.subr.bf16.mxu0 %v3956_v45 }
 0x174   :  { %3372 = vmatpush3.bf16.msra.mxu0 %v3957_v24 }
 0x175   :  { %3373 = vmatprep.subr.bf16.mxu0 %v3958_v43  ;;  %v3350_v43 = vld [vmem:[%s4539_s12] ss:$0 sm:$0xff] }
 0x178   :  { %3374 = vmatpush3.bf16.msra.mxu0 %v3959_v55 }
 0x179   :  { %3424 = vmatprep.subr.bf16.mxu0 %v4028_v46 }
 0x18f   :  { %v1875_v4 = vpop.f32.mrf.mxu0 }
 0x190   :  { %v1916_v5 = vpop.f32.mrf.mxu1  ;;  %v1876_v33 = vadd.f32 %v1875_v4, %v330_v31 }
 0x191   :  { %v1877_v6 = vpop.f32.mrf.mxu0 }
 0x192   :  { %v1918_v7 = vpop.f32.mrf.mxu1  ;;  %v1878_v34 = vadd.f32 %v1877_v6, %v334_v32  ;;  %v1917_v35 = vadd.f32 %v1916_v5, %v1876_v33  ;;  %v3970_v32 = vld [vmem:[%s4536_s9 + $0x8] sm:$0xff]   ;;  %v3971_v33 = vld [vmem:[%s4536_s9] sm:$0xff]  }
 0x193   :  { %v1879_v8 = vpop.f32.mrf.mxu0 }
 0x194   :  { %v1920_v9 = vpop.f32.mrf.mxu1  ;;  %v1919_v44 = vadd.f32 %v1918_v7, %v1878_v34  ;;  %v3972_v34 = vld [vmem:[%s4538_s11 + $0x38] sm:$0xff]  }
 0x195   :  { %v1880_v10 = vpop.f32.mrf.mxu0 }
 0x196   :  { %v1921_v11 = vpop.f32.mrf.mxu1 }
 0x1cf   :  { %v1957_v36 = vpop.f32.mrf.mxu0 }
 0x1d0   :  { %v1998_v40 = vpop.f32.mrf.mxu1  ;;  %v1958_v47 = vadd.f32 %v1957_v36, %v1917_v35  ;;  %v3973_v35 = vld [vmem:[%s4538_s11 + $0x30] sm:$0xff]   ;;  %v3974_v36 = vld [vmem:[%s4538_s11 + $0x28] sm:$0xff]  }
 0x1d1   :  { %v1959_v62 = vpop.f32.mrf.mxu0 }
 0x1d2   :  { %v2000_v14 = vpop.f32.mrf.mxu1  ;;  %v1999_v63 = vadd.f32 %v1998_v40, %v1958_v47  ;;  %v1960_v29 = vadd.f32 %v1959_v62, %v1919_v44  ;;  %v3975_v40 = vld [vmem:[%s4538_s11 + $0x20] sm:$0xff]   ;;  %v3976_v44 = vld [vmem:[%s4538_s11 + $0x18] sm:$0xff]   ;;  %v3977_v47 = vld [vmem:[%s4538_s11 + $0x10] sm:$0xff]  }
 0x1d3   :  { %v1961_v3 = vpop.f32.mrf.mxu0  ;;  %v3335_v62 = vld [vmem:[%s4535_s8] ss:$0 sm:$0xff] }
 0x1d4   :  { %v2002_v19 = vpop.f32.mrf.mxu1  ;;  %v2001_v48 = vadd.f32 %v2000_v14, %v1960_v29  ;;  %v2007_v49 = vmax.f32 %v1999_v63, 0.0 }
 0x1d5   :  { %v1962_v50 = vpop.f32.mrf.mxu0 }
 0x1d6   :  { %v2003_v51 = vpop.f32.mrf.mxu1  ;;  %v2008_v52 = vmax.f32 %v2001_v48, 0.0  ;;  %v2011_v38 = vpack.c.bf16 %v2007_v49, %v2007_v49  ;;  %v3978_v50 = vld [vmem:[%s4538_s11 + $0x8] sm:$0xff]  }
 0x1d7   :  { %v3979_v51 = vld [vmem:[%s4538_s11] sm:$0xff]  }
 0x1d8   :  { %v2012_v18 = vpack.c.bf16 %v2008_v52, %v2008_v52  ;;  %v3344_v52 = vld [vmem:[%s4537_s10] ss:$0 sm:$0xff]  ;;  %s4000_s10 = scalar_lea.vmem %s2990_s20, 32 }
 0x1d9   :  { %p4001_p5 = scmp.ne.s32.totalorder %s2990_s20, %s4000_s10  ;;  %p4006_p7 = scmp.lt.s32.totalorder %s4000_s10, %s4000_s10 }
 0x1da   :  { %2482 = vmatprep.mubr.bf16.mxu1 %v2012_v18 }
 0x1db   :  { %2483 = vmatmul.mubr.bf16.vlgmr.msra.gmra.mxu1 %v2011_v38  ;;  %p4007_p8 = por %p4006_p7, %p4005_p6 }
 0x1dc   :  { %3405 = vmatpush3.bf16.msra.mxu1 %v3960_v57  ;;  %3420 = vmatprep.mubr.msk.bf16.mxu1 %vm4029_vm0, %v4028_v46 }
 0x1dd   :  { %3406 = vmatprep.subr.bf16.mxu1 %v4028_v46  ;;  %p4008_p9 = pnand %p4007_p8, %p4001_p5 }
 0x1e0   :  { %3407 = vmatpush3.bf16.msra.mxu1 %v3961_v58 }
 0x1e1   :  { %3408 = vmatprep.subr.bf16.mxu1 %v4028_v46 }
 0x1e4   :  { %3409 = vmatpush3.bf16.msra.mxu1 %v3962_v59 }
 0x1e5   :  { %3410 = vmatprep.subr.bf16.mxu1 %v4028_v46 }
 0x1e8   :  { %3411 = vmatpush3.bf16.msra.mxu1 %v3963_v60 }
 0x1e9   :  { %3412 = vmatprep.subr.bf16.mxu1 %v4028_v46 }
 0x1ec   :  { %3413 = vmatpush3.bf16.msra.mxu1 %v3964_v61 }
 0x1ed   :  { %3414 = vmatprep.subr.bf16.mxu1 %v4028_v46 }
 0x1f0   :  { %3415 = vmatpush3.bf16.msra.mxu1 %v3965_v37 }
 0x1f1   :  { %3416 = vmatprep.subr.bf16.mxu1 %v4028_v46 }
 0x1f4   :  { %3417 = vmatpush3.bf16.msra.mxu1 %v3966_v42 }
 0x1f5   :  { %3418 = vmatprep.subr.bf16.mxu1 %v4028_v46 }
 0x1f8   :  { %3419 = vmatpush3.bf16.msra.mxu1 %v3967_v39 }
 0x1f9   :  { %3436 = vmatprep.subr.bf16.mxu1 %v4028_v46 }
 0x21b   :  { %v2443_v41 = vpop.f32.mrf.mxu0 }
 0x21c   :  { %v2444_v4 = vadd.f32 %v2443_v41, %v2082_v1 }
 0x21d   :  { %v2445_v53 = vpop.f32.mrf.mxu0 }
 0x21e   :  { %v2446_v6 = vadd.f32 %v2445_v53, %v2086_v2 }
 0x21f   :  { %v2447_v54 = vpop.f32.mrf.mxu0 }
 0x221   :  { %v2448_v56 = vpop.f32.mrf.mxu0 }
 0x29b   :  { %v2484_v5 = vpop.f32.mrf.mxu1 }
 0x29c   :  { %v2485_v7 = vadd.f32 %v2484_v5, %v2444_v4 }
 0x29d   :  { %v2486_v8 = vpop.f32.mrf.mxu1 }
 0x29e   :  { %v2487_v9 = vadd.f32 %v2486_v8, %v2446_v6  ;;  %v2491_v10 = vmax.f32 %v2485_v7, 0.0 }
 0x29f   :  { %v2488_v11 = vpop.f32.mrf.mxu1 }
 0x2a0   :  { %v2492_v12 = vmax.f32 %v2487_v9, 0.0  ;;  %v2493_v16 = vpack.c.bf16 %v2491_v10, %v2491_v10 }
 0x2a1   :  { %v2489_v13 = vpop.f32.mrf.mxu1 }
 0x2a2   :  { %v2494_v15 = vpack.c.bf16 %v2492_v12, %v2492_v12 }
 0x2a4   :  { %2662 = vmatprep.mubr.bf16.mxu0 %v2494_v15 }
 0x2a5   :  { %2663 = vmatmul.mubr.bf16.vlgmr.msra.gmra.mxu0 %v2493_v16 }
 0x2a6   :  { %3432 = vmatprep.mubr.msk.bf16.mxu0 %vm4029_vm0, %v4028_v46  ;;  %3425 = vmatpush3.bf16.msra.mxu0 %v3968_v17 }
 0x2a7   :  { %3426 = vmatprep.subr.bf16.mxu0 %v4028_v46 }
 0x2aa   :  { %3427 = vmatpush3.bf16.msra.mxu0 %v3969_v20 }
 0x2ab   :  { %3428 = vmatprep.subr.bf16.mxu0 %v4028_v46 }
 0x2ae   :  { %3429 = vmatpush3.bf16.msra.mxu0 %v3970_v32 }
 0x2af   :  { %3430 = vmatprep.subr.bf16.mxu0 %v4028_v46 }
 0x2b2   :  { %3431 = vmatpush3.bf16.msra.mxu0 %v3971_v33 }
 0x365   :  { %v3375_v21 = vpop.f32.mrf.mxu0 }
 0x367   :  { %v3376_v23 = vpop.f32.mrf.mxu0 }
 0x368   :  { %v3377_v25 = vadd.f32 %v3376_v23, %v3375_v21 }
 0x369   :  { %v3378_v26 = vpop.f32.mrf.mxu0 }
 0x36a   :  { %v2665_v27 = vadd.f32 %v3377_v25, %v3318_v22 }
 0x36b   :  { %v3379_v28 = vpop.f32.mrf.mxu0 }
 0x36c   :  { %v2670_v30 = vmax.f32 %v2665_v27, 0.0 }
 0x36e   :  { %v2671_v31 = vpack.c.bf16 %v2670_v30, %v2670_v30 }
 0x370   :  { %3421 = vmatmul.mubr.bf16.vlgmr.msra.gmra.mxu1 %v2671_v31 }
 0x371   :  { %3452 = vmatprep.mubr.msk.bf16.mxu1 %vm4029_vm0, %v4028_v46  ;;  %3437 = vmatpush3.bf16.msra.mxu1 %v3972_v34 }
 0x372   :  { %3438 = vmatprep.subr.bf16.mxu1 %v4028_v46 }
 0x375   :  { %3439 = vmatpush3.bf16.msra.mxu1 %v3973_v35 }
 0x376   :  { %3440 = vmatprep.subr.bf16.mxu1 %v4028_v46 }
 0x379   :  { %3441 = vmatpush3.bf16.msra.mxu1 %v3974_v36 }
 0x37a   :  { %3442 = vmatprep.subr.bf16.mxu1 %v4028_v46 }
 0x37d   :  { %3443 = vmatpush3.bf16.msra.mxu1 %v3975_v40 }
 0x37e   :  { %3444 = vmatprep.subr.bf16.mxu1 %v4028_v46 }
 0x381   :  { %3445 = vmatpush3.bf16.msra.mxu1 %v3976_v44 }
 0x382   :  { %3446 = vmatprep.subr.bf16.mxu1 %v4028_v46 }
 0x385   :  { %3447 = vmatpush3.bf16.msra.mxu1 %v3977_v47 }
 0x386   :  { %3448 = vmatprep.subr.bf16.mxu1 %v4028_v46 }
 0x389   :  { %3449 = vmatpush3.bf16.msra.mxu1 %v3978_v50 }
 0x38a   :  { %3450 = vmatprep.subr.bf16.mxu1 %v4028_v46 }
 0x38d   :  { %3451 = vmatpush3.bf16.msra.mxu1 %v3979_v51 }
 0x430   :  { %v2777_v14 = vpop.f32.mrf.mxu1 }
 0x431   :  { %v2778_v63 = vadd.f32 %v3335_v62, %v2777_v14 }
 0x432   :  { %v3422_v29 = vpop.f32.mrf.mxu1 }
 0x433   :  { %v2783_v3 = vmax.f32 %v2778_v63, 0.0 }
 0x434   :  { %v2780_v19 = vpop.f32.mrf.mxu1 }
 0x435   :  { %v2784_v48 = vpack.c.bf16 %v2783_v3, %v2783_v3 }
 0x436   :  { %v3423_v49 = vpop.f32.mrf.mxu1 }
 0x437   :  { %3433 = vmatmul.mubr.msk.bf16.vlgmr.msra.gmra.mxu0 %vm2824_vm1, %v2784_v48 }
 0x4f7   :  { %v2862_v18 = vpop.f32.mrf.mxu0 }
 0x4f8   :  { %v2863_v38 = vadd.f32 %v3344_v52, %v2862_v18 }
 0x4f9   :  { %v3434_v41 = vpop.f32.mrf.mxu0 }
 0x4fa   :  { %v2868_v45 = vmax.f32 %v2863_v38, 0.0 }
 0x4fb   :  { %v2865_v24 = vpop.f32.mrf.mxu0 }
 0x4fc   :  { %v2869_v53 = vpack.c.bf16 %v2868_v45, %v2868_v45 }
 0x4fd   :  { %v3435_v54 = vpop.f32.mrf.mxu0 }
 0x4fe   :  { %3453 = vmatmul.mubr.bf16.vlgmr.msra.gmra.mxu1 %v2869_v53 }
 0x5be   :  { %v2975_v55 = vpop.f32.mrf.mxu1 }
 0x5bf   :  { %v2976_v56 = vadd.f32 %v3350_v43, %v2975_v55 }
 0x5c0   :  { %v3454_v57 = vpop.f32.mrf.mxu1 }
 0x5c1   :  { %2982 = vst.msk [vmem:[#allocation5] sm:$0x3] %vm2981_vm2, %v2976_v56 }
 0x5c2   :  { %v2978_v46 = vpop.f32.mrf.mxu1 }
 0x5c3   :  { %4011 = shalt.err (!%p4008_p9)
}
 0x5c4   :  { %2992 = dma.vmem_to_hbm [thread:$0]  %s2990_s20, 32, %s4540_s13, [#allocation4]   ;;  %v3455_v58 = vpop.f32.mrf.mxu1 }
 0x5c5   :  { %4022 = dma.done.wait [#allocation4], 32  }
 0x5c6   :  { %4023 = vsyncadd [#allocation4], 4294967264 }
 0x5c7   :  { %2996 = vsyncpa [#allocation3], 1 }
 0x5c8   :  { %2997 = vsyncpa [#allocation4], 1 }

</bundles_post_ra>
